<compile_context>
chip_gen: v7x
topology: tpu7x:2x2x1
jax: 0.10.0
libtpu: 0.0.40
codegen_flags: <defaults>
</compile_context>

<pallas_src>
import functools
import math

import jax
import jax.numpy as jnp
from jax.experimental import pallas as pl
from jax.experimental.pallas import tpu as pltpu

NEG_SLOPE = 0.01  # F.leaky_relu default negative_slope


def _round_up(a, b):
    return (a + b - 1) // b * b


def _vmem_budget_bytes():
    """Generation-aware VMEM budget: ~3/4 of physical VMEM, capped at 96 MiB.

    -> ~96 MiB on v5e/v6e (128 MiB VMEM), ~48 MiB on v7x (64 MiB per TC).
    Falls back to a v7x-safe 48 MiB if the hardware query is unavailable.
    """
    cap = 64 * 1024 * 1024  # conservative default (v7x per-TC VMEM)
    try:
        info = pltpu.get_tpu_info()
        cap = int(getattr(info, "vmem_capacity_bytes", cap) or cap)
    except Exception:
        pass
    return min(cap * 3 // 4, 96 * 1024 * 1024)


VMEM_BUDGET = _vmem_budget_bytes()


# --------------------------------------------------------------------------
# Fused kernel: out = lrelu(lrelu(lrelu(x@W1+b1)@W2+b2)@W3+b3)
# --------------------------------------------------------------------------

def _ffn_kernel(x_ref, w1_ref, b1_ref, w2_ref, b2_ref, w3_ref, b3_ref, o_ref):
    def layer(h_bf16, w_ref, b_ref):
        acc = jnp.dot(h_bf16, w_ref[...], preferred_element_type=jnp.float32)
        acc = acc + b_ref[...]                       # bias in f32
        return jnp.maximum(acc, NEG_SLOPE * acc)     # leaky_relu (0 < slope < 1)

    h = layer(x_ref[...], w1_ref, b1_ref)
    h = layer(h.astype(jnp.bfloat16), w2_ref, b2_ref)
    h = layer(h.astype(jnp.bfloat16), w3_ref, b3_ref)
    o_ref[...] = h.astype(o_ref.dtype)


# --------------------------------------------------------------------------
# One-time parameter preparation (keeps pad + bf16 cast out of the hot path).
# Weights stored as (in, out), i.e. transposed vs torch's (out, in).
# --------------------------------------------------------------------------

def prepare_params(params):
    d_in, d_out = params["w1"].shape
    assert d_in == d_out, "FeedForward chaining requires in_dim == out_dim"
    dp = _round_up(d_in, 128)  # lane-dense feature dim

    def pad_w(w):
        w = w.astype(jnp.float32)
        return jnp.pad(w, ((0, dp - w.shape[0]), (0, dp - w.shape[1]))
                       ).astype(jnp.bfloat16)

    def pad_b(b):
        return jnp.pad(b.astype(jnp.float32).reshape(1, -1),
                       ((0, 0), (0, dp - b.shape[-1])))

    return {"w1": pad_w(params["w1"]), "b1": pad_b(params["b1"]),
            "w2": pad_w(params["w2"]), "b2": pad_b(params["b2"]),
            "w3": pad_w(params["w3"]), "b3": pad_b(params["b3"])}


# --------------------------------------------------------------------------
# Forward
# --------------------------------------------------------------------------

@functools.partial(jax.jit,
                   static_argnames=("tm", "single_buffer_weights", "out_dtype"))
def _forward_impl(w1, b1, w2, b2, w3, b3, x, *, tm, single_buffer_weights,
                  out_dtype):
    dp = w1.shape[0]
    d = x.shape[-1]
    assert _round_up(d, 128) == dp, "params not prepared for this feature dim"
    lead = x.shape[:-1]

    x2 = x.reshape(-1, d)
    m = x2.shape[0]
    out_itemsize = jnp.dtype(out_dtype).itemsize

    # --- row tiling: multiples of 16 (bf16 sublane tile), as large as fits ---
    mp16 = _round_up(max(m, 16), 16)
    tm_eff = min(max(_round_up(tm, 16), 16), mp16)

    w_bufs = 1 if single_buffer_weights else 2
    weight_bytes = w_bufs * 3 * (dp * dp * 2 + 8 * dp * 4)  # bf16 W + f32 bias rows

    def _fits(t):
        io = 2 * t * dp * 2 + 2 * t * dp * out_itemsize  # dbl-buffered x(bf16)+out
        return weight_bytes + io <= VMEM_BUDGET

    while tm_eff > 16 and not _fits(tm_eff):
        tm_eff = max(16, _round_up(tm_eff // 2, 16))
    if not _fits(tm_eff):
        # TODO(synk): add K/N grid tiling (reduction axis last, 'arbitrary',
        # f32 accumulator scratch + pl.when init/finalize) for hidden dims whose
        # three resident weight slabs exceed the per-generation VMEM budget.
        raise ValueError("hidden dim too large for the fused resident-weight kernel")

    mp = _round_up(mp16, tm_eff)
    # v7x megacore: make sure the 'parallel' row axis has >= 2 blocks.
    if mp // tm_eff < 2 and tm_eff > 16:
        tm_eff = max(16, _round_up(tm_eff // 2, 16))
        mp = _round_up(mp16, tm_eff)
    n_tiles = mp // tm_eff

    # Zero padding keeps the matmul results exact; padded rows are sliced off.
    xp = jnp.pad(x2, ((0, mp - m), (0, dp - d))).astype(jnp.bfloat16)

    if single_buffer_weights:
        w_spec = pl.BlockSpec((dp, dp), lambda i: (0, 0),
                              pipeline_mode=pl.Buffered(1))
        b_spec = pl.BlockSpec((1, dp), lambda i: (0, 0),
                              pipeline_mode=pl.Buffered(1))
    else:
        w_spec = pl.BlockSpec((dp, dp), lambda i: (0, 0))
        b_spec = pl.BlockSpec((1, dp), lambda i: (0, 0))
    x_spec = pl.BlockSpec((tm_eff, dp), lambda i: (i, 0))

    out = pl.pallas_call(
        _ffn_kernel,
        out_shape=jax.ShapeDtypeStruct((mp, dp), out_dtype),
        grid=(n_tiles,),
        in_specs=[x_spec, w_spec, b_spec, w_spec, b_spec, w_spec, b_spec],
        out_specs=x_spec,
        compiler_params=pltpu.CompilerParams(
            dimension_semantics=("parallel",),   # megacore on v7x
            vmem_limit_bytes=VMEM_BUDGET),
    )(xp, w1, b1, w2, b2, w3, b3)

    return out[:m, :d].reshape(*lead, d)


def feedforward_forward(prepped, x, *, tm=512, out_dtype=jnp.float32):
    """x: (..., in_dim) -> (..., out_dim) with out_dim == in_dim."""
    args = (prepped["w1"], prepped["b1"], prepped["w2"], prepped["b2"],
            prepped["w3"], prepped["b3"], x)
    try:
        return _forward_impl(*args, tm=tm, single_buffer_weights=True,
                             out_dtype=out_dtype)
    except Exception:
        # Fallback if this jax build rejects pipeline_mode=pl.Buffered(1):
        # identical semantics, default double-buffered weight blocks.
        return _forward_impl(*args, tm=tm, single_buffer_weights=False,
                             out_dtype=out_dtype)


# --------------------------------------------------------------------------
# Deterministic parameters (PyTorch nn.Linear default init) + f32 reference.
# --------------------------------------------------------------------------

def make_params(key, in_dim, out_dim):
    ks = jax.random.split(key, 6)

    def linear(kw, kb, fan_in, fan_out):
        bound = 1.0 / math.sqrt(fan_in)
        w = jax.random.uniform(kw, (fan_in, fan_out), jnp.float32, -bound, bound)
        b = jax.random.uniform(kb, (fan_out,), jnp.float32, -bound, bound)
        return w, b

    w1, b1 = linear(ks[0], ks[1], in_dim, out_dim)
    w2, b2 = linear(ks[2], ks[3], in_dim, out_dim)
    w3, b3 = linear(ks[4], ks[5], in_dim, out_dim)
    return {"w1": w1, "b1": b1, "w2": w2, "b2": b2, "w3": w3, "b3": b3}


def feedforward_ref(params, x):
    def layer(h, w, b):
        y = h @ w + b
        return jnp.where(y >= 0.0, y, NEG_SLOPE * y)

    h = layer(x, params["w1"], params["b1"])
    h = layer(h, params["w2"], params["b2"])
    h = layer(h, params["w3"], params["b3"])
    return h


if __name__ == "__main__":
    key = jax.random.PRNGKey(0)
    pkey, xkey = jax.random.split(key)

    IN_DIM = OUT_DIM = 256            # module requires in_dim == out_dim
    BATCH, SEQ = 2, 128               # 256 rows -> >=2 parallel row tiles

    params = make_params(pkey, IN_DIM, OUT_DIM)
    prepped = prepare_params(params)  # one-time pad + bf16 cast (out of hot path)
    x = jax.random.normal(xkey, (BATCH, SEQ, IN_DIM), dtype=jnp.float32)

    out = feedforward_forward(prepped, x)
    jax.block_until_ready(out)

    assert out.shape == (BATCH, SEQ, OUT_DIM), out.shape
    assert bool(jnp.all(jnp.isfinite(out)))

    # f32 reference (bf16 MXU operands => allow small relative deviation)
    ref = feedforward_ref(params, x.reshape(-1, IN_DIM)).reshape(out.shape)
    rel_err = float(jnp.max(jnp.abs(out - ref)) / (jnp.max(jnp.abs(ref)) + 1e-6))
    assert rel_err < 5e-2, rel_err

    print("KERNEL_OK")
</pallas_src>

<mosaic_0001>
module attributes {stable_mosaic.version = 11 : i64} {
  func.func @_ffn_kernel(%arg0: i32, %arg1: memref<128x256xbf16, #tpu.memory_space<vmem>>, %arg2: memref<256x256xbf16, #tpu.memory_space<vmem>>, %arg3: memref<1x256xf32, #tpu.memory_space<vmem>>, %arg4: memref<256x256xbf16, #tpu.memory_space<vmem>>, %arg5: memref<1x256xf32, #tpu.memory_space<vmem>>, %arg6: memref<256x256xbf16, #tpu.memory_space<vmem>>, %arg7: memref<1x256xf32, #tpu.memory_space<vmem>>, %arg8: memref<128x256xf32, #tpu.memory_space<vmem>>) attributes {dimension_semantics = [#tpu.dimension_semantics<parallel>], iteration_bounds = array<i64: 2>, scalar_prefetch = 0 : i64, scratch_operands = 0 : i64, tpu.core_type = #tpu.core_type<tc>, window_params = [{transform_indices = @transform_0, window_bounds = array<i64: 128, 256>}, {pipeline_mode = #tpu.pipeline_mode<synchronous>, transform_indices = @transform_1, window_bounds = array<i64: 256, 256>}, {pipeline_mode = #tpu.pipeline_mode<synchronous>, transform_indices = @transform_2, window_bounds = array<i64: 1, 256>}, {pipeline_mode = #tpu.pipeline_mode<synchronous>, transform_indices = @transform_3, window_bounds = array<i64: 256, 256>}, {pipeline_mode = #tpu.pipeline_mode<synchronous>, transform_indices = @transform_4, window_bounds = array<i64: 1, 256>}, {pipeline_mode = #tpu.pipeline_mode<synchronous>, transform_indices = @transform_5, window_bounds = array<i64: 256, 256>}, {pipeline_mode = #tpu.pipeline_mode<synchronous>, transform_indices = @transform_6, window_bounds = array<i64: 1, 256>}, {transform_indices = @transform_7, window_bounds = array<i64: 128, 256>}]} {
    %c0 = arith.constant 0 : index
    %c0_0 = arith.constant 0 : index
    %0 = vector.load %arg1[%c0, %c0_0] : memref<128x256xbf16, #tpu.memory_space<vmem>>, vector<128x256xbf16>
    %c0_1 = arith.constant 0 : index
    %c0_2 = arith.constant 0 : index
    %1 = vector.load %arg2[%c0_1, %c0_2] : memref<256x256xbf16, #tpu.memory_space<vmem>>, vector<256x256xbf16>
    %cst = arith.constant dense<0.000000e+00> : vector<128x256xf32>
    %2 = tpu.matmul %0, %1, %cst {dimension_numbers = #tpu.dot_dimension_numbers<[1], [0], [0], [1], [0, 0, 1, 1], [], []>} : vector<128x256xbf16>, vector<256x256xbf16>, vector<128x256xf32> -> vector<128x256xf32>
    %c0_3 = arith.constant 0 : index
    %c0_4 = arith.constant 0 : index
    %3 = vector.load %arg3[%c0_3, %c0_4] : memref<1x256xf32, #tpu.memory_space<vmem>>, vector<1x256xf32>
    %4 = vector.broadcast %3 : vector<1x256xf32> to vector<128x256xf32>
    %5 = arith.addf %2, %4 : vector<128x256xf32>
    %cst_5 = arith.constant 0.00999999977 : f32
    %6 = vector.broadcast %cst_5 : f32 to vector<128x256xf32>
    %7 = arith.mulf %6, %5 : vector<128x256xf32>
    %8 = arith.maximumf %5, %7 : vector<128x256xf32>
    %9 = arith.truncf %8 : vector<128x256xf32> to vector<128x256xbf16>
    %c0_6 = arith.constant 0 : index
    %c0_7 = arith.constant 0 : index
    %10 = vector.load %arg4[%c0_6, %c0_7] : memref<256x256xbf16, #tpu.memory_space<vmem>>, vector<256x256xbf16>
    %cst_8 = arith.constant dense<0.000000e+00> : vector<128x256xf32>
    %11 = tpu.matmul %9, %10, %cst_8 {dimension_numbers = #tpu.dot_dimension_numbers<[1], [0], [0], [1], [0, 0, 1, 1], [], []>} : vector<128x256xbf16>, vector<256x256xbf16>, vector<128x256xf32> -> vector<128x256xf32>
    %c0_9 = arith.constant 0 : index
    %c0_10 = arith.constant 0 : index
    %12 = vector.load %arg5[%c0_9, %c0_10] : memref<1x256xf32, #tpu.memory_space<vmem>>, vector<1x256xf32>
    %13 = vector.broadcast %12 : vector<1x256xf32> to vector<128x256xf32>
    %14 = arith.addf %11, %13 : vector<128x256xf32>
    %cst_11 = arith.constant 0.00999999977 : f32
    %15 = vector.broadcast %cst_11 : f32 to vector<128x256xf32>
    %16 = arith.mulf %15, %14 : vector<128x256xf32>
    %17 = arith.maximumf %14, %16 : vector<128x256xf32>
    %18 = arith.truncf %17 : vector<128x256xf32> to vector<128x256xbf16>
    %c0_12 = arith.constant 0 : index
    %c0_13 = arith.constant 0 : index
    %19 = vector.load %arg6[%c0_12, %c0_13] : memref<256x256xbf16, #tpu.memory_space<vmem>>, vector<256x256xbf16>
    %cst_14 = arith.constant dense<0.000000e+00> : vector<128x256xf32>
    %20 = tpu.matmul %18, %19, %cst_14 {dimension_numbers = #tpu.dot_dimension_numbers<[1], [0], [0], [1], [0, 0, 1, 1], [], []>} : vector<128x256xbf16>, vector<256x256xbf16>, vector<128x256xf32> -> vector<128x256xf32>
    %c0_15 = arith.constant 0 : index
    %c0_16 = arith.constant 0 : index
    %21 = vector.load %arg7[%c0_15, %c0_16] : memref<1x256xf32, #tpu.memory_space<vmem>>, vector<1x256xf32>
    %22 = vector.broadcast %21 : vector<1x256xf32> to vector<128x256xf32>
    %23 = arith.addf %20, %22 : vector<128x256xf32>
    %cst_17 = arith.constant 0.00999999977 : f32
    %24 = vector.broadcast %cst_17 : f32 to vector<128x256xf32>
    %25 = arith.mulf %24, %23 : vector<128x256xf32>
    %26 = arith.maximumf %23, %25 : vector<128x256xf32>
    %c0_18 = arith.constant 0 : index
    %c0_19 = arith.constant 0 : index
    %27 = vector.load %arg8[%c0_18, %c0_19] : memref<128x256xf32, #tpu.memory_space<vmem>>, vector<128x256xf32>
    tpu.vector_store %arg8[%c0_18, %c0_19], %26 {strides = array<i32>} : memref<128x256xf32, #tpu.memory_space<vmem>>, vector<128x256xf32>,
    return
  }
  func.func @transform_0(%arg0: i32) -> (i32, i32) {
    %c0_i32 = arith.constant 0 : i32
    %c0_i32_0 = arith.constant 0 : i32
    return %arg0, %c0_i32 : i32, i32
  }
  func.func @transform_1(%arg0: i32) -> (i32, i32) {
    %c0_i32 = arith.constant 0 : i32
    %c0_i32_0 = arith.constant 0 : i32
    %c0_i32_1 = arith.constant 0 : i32
    return %c0_i32, %c0_i32_0 : i32, i32
  }
  func.func @transform_2(%arg0: i32) -> (i32, i32) {
    %c0_i32 = arith.constant 0 : i32
    %c0_i32_0 = arith.constant 0 : i32
    %c0_i32_1 = arith.constant 0 : i32
    return %c0_i32, %c0_i32_0 : i32, i32
  }
  func.func @transform_3(%arg0: i32) -> (i32, i32) {
    %c0_i32 = arith.constant 0 : i32
    %c0_i32_0 = arith.constant 0 : i32
    %c0_i32_1 = arith.constant 0 : i32
    return %c0_i32, %c0_i32_0 : i32, i32
  }
  func.func @transform_4(%arg0: i32) -> (i32, i32) {
    %c0_i32 = arith.constant 0 : i32
    %c0_i32_0 = arith.constant 0 : i32
    %c0_i32_1 = arith.constant 0 : i32
    return %c0_i32, %c0_i32_0 : i32, i32
  }
  func.func @transform_5(%arg0: i32) -> (i32, i32) {
    %c0_i32 = arith.constant 0 : i32
    %c0_i32_0 = arith.constant 0 : i32
    %c0_i32_1 = arith.constant 0 : i32
    return %c0_i32, %c0_i32_0 : i32, i32
  }
  func.func @transform_6(%arg0: i32) -> (i32, i32) {
    %c0_i32 = arith.constant 0 : i32
    %c0_i32_0 = arith.constant 0 : i32
    %c0_i32_1 = arith.constant 0 : i32
    return %c0_i32, %c0_i32_0 : i32, i32
  }
  func.func @transform_7(%arg0: i32) -> (i32, i32) {
    %c0_i32 = arith.constant 0 : i32
    %c0_i32_0 = arith.constant 0 : i32
    return %arg0, %c0_i32 : i32, i32
  }
}

module attributes {stable_mosaic.version = 11 : i64} {
  func.func @_ffn_kernel(%arg0: i32, %arg1: memref<128x256xbf16, #tpu.memory_space<vmem>>, %arg2: memref<256x256xbf16, #tpu.memory_space<vmem>>, %arg3: memref<1x256xf32, #tpu.memory_space<vmem>>, %arg4: memref<256x256xbf16, #tpu.memory_space<vmem>>, %arg5: memref<1x256xf32, #tpu.memory_space<vmem>>, %arg6: memref<256x256xbf16, #tpu.memory_space<vmem>>, %arg7: memref<1x256xf32, #tpu.memory_space<vmem>>, %arg8: memref<128x256xf32, #tpu.memory_space<vmem>>) attributes {dimension_semantics = [#tpu.dimension_semantics<parallel>], iteration_bounds = array<i64: 2>, scalar_prefetch = 0 : i64, scratch_operands = 0 : i64, tpu.core_type = #tpu.core_type<tc>, window_params = [{transform_indices = @transform_0, window_bounds = array<i64: 128, 256>}, {pipeline_mode = #tpu.pipeline_mode<synchronous>, transform_indices = @transform_1, window_bounds = array<i64: 256, 256>}, {pipeline_mode = #tpu.pipeline_mode<synchronous>, transform_indices = @transform_2, window_bounds = array<i64: 1, 256>}, {pipeline_mode = #tpu.pipeline_mode<synchronous>, transform_indices = @transform_3, window_bounds = array<i64: 256, 256>}, {pipeline_mode = #tpu.pipeline_mode<synchronous>, transform_indices = @transform_4, window_bounds = array<i64: 1, 256>}, {pipeline_mode = #tpu.pipeline_mode<synchronous>, transform_indices = @transform_5, window_bounds = array<i64: 256, 256>}, {pipeline_mode = #tpu.pipeline_mode<synchronous>, transform_indices = @transform_6, window_bounds = array<i64: 1, 256>}, {transform_indices = @transform_7, window_bounds = array<i64: 128, 256>}]} {
    %c0 = arith.constant 0 : index
    %c0_0 = arith.constant 0 : index
    %0 = vector.load %arg1[%c0, %c0_0] : memref<128x256xbf16, #tpu.memory_space<vmem>>, vector<128x256xbf16>
    %c0_1 = arith.constant 0 : index
    %c0_2 = arith.constant 0 : index
    %1 = vector.load %arg2[%c0_1, %c0_2] : memref<256x256xbf16, #tpu.memory_space<vmem>>, vector<256x256xbf16>
    %cst = arith.constant dense<0.000000e+00> : vector<128x256xf32>
    %2 = tpu.matmul %0, %1, %cst {dimension_numbers = #tpu.dot_dimension_numbers<[1], [0], [0], [1], [0, 0, 1, 1], [], []>} : vector<128x256xbf16>, vector<256x256xbf16>, vector<128x256xf32> -> vector<128x256xf32>
    %c0_3 = arith.constant 0 : index
    %c0_4 = arith.constant 0 : index
    %3 = vector.load %arg3[%c0_3, %c0_4] : memref<1x256xf32, #tpu.memory_space<vmem>>, vector<1x256xf32>
    %4 = vector.broadcast %3 : vector<1x256xf32> to vector<128x256xf32>
    %5 = arith.addf %2, %4 : vector<128x256xf32>
    %cst_5 = arith.constant 0.00999999977 : f32
    %6 = vector.broadcast %cst_5 : f32 to vector<128x256xf32>
    %7 = arith.mulf %6, %5 : vector<128x256xf32>
    %8 = arith.maximumf %5, %7 : vector<128x256xf32>
    %9 = arith.truncf %8 : vector<128x256xf32> to vector<128x256xbf16>
    %c0_6 = arith.constant 0 : index
    %c0_7 = arith.constant 0 : index
    %10 = vector.load %arg4[%c0_6, %c0_7] : memref<256x256xbf16, #tpu.memory_space<vmem>>, vector<256x256xbf16>
    %cst_8 = arith.constant dense<0.000000e+00> : vector<128x256xf32>
    %11 = tpu.matmul %9, %10, %cst_8 {dimension_numbers = #tpu.dot_dimension_numbers<[1], [0], [0], [1], [0, 0, 1, 1], [], []>} : vector<128x256xbf16>, vector<256x256xbf16>, vector<128x256xf32> -> vector<128x256xf32>
    %c0_9 = arith.constant 0 : index
    %c0_10 = arith.constant 0 : index
    %12 = vector.load %arg5[%c0_9, %c0_10] : memref<1x256xf32, #tpu.memory_space<vmem>>, vector<1x256xf32>
    %13 = vector.broadcast %12 : vector<1x256xf32> to vector<128x256xf32>
    %14 = arith.addf %11, %13 : vector<128x256xf32>
    %cst_11 = arith.constant 0.00999999977 : f32
    %15 = vector.broadcast %cst_11 : f32 to vector<128x256xf32>
    %16 = arith.mulf %15, %14 : vector<128x256xf32>
    %17 = arith.maximumf %14, %16 : vector<128x256xf32>
    %18 = arith.truncf %17 : vector<128x256xf32> to vector<128x256xbf16>
    %c0_12 = arith.constant 0 : index
    %c0_13 = arith.constant 0 : index
    %19 = vector.load %arg6[%c0_12, %c0_13] : memref<256x256xbf16, #tpu.memory_space<vmem>>, vector<256x256xbf16>
    %cst_14 = arith.constant dense<0.000000e+00> : vector<128x256xf32>
    %20 = tpu.matmul %18, %19, %cst_14 {dimension_numbers = #tpu.dot_dimension_numbers<[1], [0], [0], [1], [0, 0, 1, 1], [], []>} : vector<128x256xbf16>, vector<256x256xbf16>, vector<128x256xf32> -> vector<128x256xf32>
    %c0_15 = arith.constant 0 : index
    %c0_16 = arith.constant 0 : index
    %21 = vector.load %arg7[%c0_15, %c0_16] : memref<1x256xf32, #tpu.memory_space<vmem>>, vector<1x256xf32>
    %22 = vector.broadcast %21 : vector<1x256xf32> to vector<128x256xf32>
    %23 = arith.addf %20, %22 : vector<128x256xf32>
    %cst_17 = arith.constant 0.00999999977 : f32
    %24 = vector.broadcast %cst_17 : f32 to vector<128x256xf32>
    %25 = arith.mulf %24, %23 : vector<128x256xf32>
    %26 = arith.maximumf %23, %25 : vector<128x256xf32>
    %c0_18 = arith.constant 0 : index
    %c0_19 = arith.constant 0 : index
    %27 = vector.load %arg8[%c0_18, %c0_19] : memref<128x256xf32, #tpu.memory_space<vmem>>, vector<128x256xf32>
    tpu.vector_store %arg8[%c0_18, %c0_19], %26 {strides = array<i32>} : memref<128x256xf32, #tpu.memory_space<vmem>>, vector<128x256xf32>,
    return
  }
  func.func @transform_0(%arg0: i32) -> (i32, i32) {
    %c0_i32 = arith.constant 0 : i32
    %c0_i32_0 = arith.constant 0 : i32
    return %arg0, %c0_i32 : i32, i32
  }
  func.func @transform_1(%arg0: i32) -> (i32, i32) {
    %c0_i32 = arith.constant 0 : i32
    %c0_i32_0 = arith.constant 0 : i32
    %c0_i32_1 = arith.constant 0 : i32
    return %c0_i32, %c0_i32_0 : i32, i32
  }
  func.func @transform_2(%arg0: i32) -> (i32, i32) {
    %c0_i32 = arith.constant 0 : i32
    %c0_i32_0 = arith.constant 0 : i32
    %c0_i32_1 = arith.constant 0 : i32
    return %c0_i32, %c0_i32_0 : i32, i32
  }
  func.func @transform_3(%arg0: i32) -> (i32, i32) {
    %c0_i32 = arith.constant 0 : i32
    %c0_i32_0 = arith.constant 0 : i32
    %c0_i32_1 = arith.constant 0 : i32
    return %c0_i32, %c0_i32_0 : i32, i32
  }
  func.func @transform_4(%arg0: i32) -> (i32, i32) {
    %c0_i32 = arith.constant 0 : i32
    %c0_i32_0 = arith.constant 0 : i32
    %c0_i32_1 = arith.constant 0 : i32
    return %c0_i32, %c0_i32_0 : i32, i32
  }
  func.func @transform_5(%arg0: i32) -> (i32, i32) {
    %c0_i32 = arith.constant 0 : i32
    %c0_i32_0 = arith.constant 0 : i32
    %c0_i32_1 = arith.constant 0 : i32
    return %c0_i32, %c0_i32_0 : i32, i32
  }
  func.func @transform_6(%arg0: i32) -> (i32, i32) {
    %c0_i32 = arith.constant 0 : i32
    %c0_i32_0 = arith.constant 0 : i32
    %c0_i32_1 = arith.constant 0 : i32
    return %c0_i32, %c0_i32_0 : i32, i32
  }
  func.func @transform_7(%arg0: i32) -> (i32, i32) {
    %c0_i32 = arith.constant 0 : i32
    %c0_i32_0 = arith.constant 0 : i32
    return %arg0, %c0_i32 : i32, i32
  }
}

</mosaic_0001>

<bundles_post_ra>
// kernel: _forward_impl.1
= control target key start
LH: loop header
LB: loop body
LE: loop exit
PB: predicated region body
PF: predicated region fallthrough
CT: control target
= control target key end

     0   :  { %12 = vsyncpa [#allocation3], 0  ;;  %s2814_s0 = inlined_call_operand.vmem [shape: bf16[256,256], index: 0, kind: input, shape index: {}]   ;;  %s2815_s1 = inlined_call_operand.vmem [shape: bf16[256,256], index: 1, kind: input, shape index: {}]   ;;  %s2816_s2 = inlined_call_operand.vmem [shape: f32[1,256], index: 2, kind: input, shape index: {}]   ;;  %s2817_s3 = inlined_call_operand.vmem [shape: bf16[256,256], index: 3, kind: input, shape index: {}]   ;;  %s2818_s4 = inlined_call_operand.vmem [shape: f32[1,256], index: 4, kind: input, shape index: {}]   ;;  %s2819_s5 = inlined_call_operand.vmem [shape: bf16[256,256], index: 5, kind: input, shape index: {}]   ;;  %s2820_s6 = inlined_call_operand.vmem [shape: f32[1,256], index: 6, kind: input, shape index: {}]   ;;  %s2821_s7 = inlined_call_operand.hbm [shape: f32[256,256], index: 7, kind: output, shape index: {}]  }
   0x1   :  { %14 = vsyncpa [#allocation3 + $0x1], 0  ;;  %s2140_s24 = smov 0   ;;  %s2142_s25 = smov 0  }
   0x2   :  { %s2144_s26 = smov 0   ;;  %s2146_s27 = smov 0  }
   0x3 LB: > { %s2161_s28 = sadd.s32 4294967295, %s2095_s27   ;;  %s1663_s29 = sadd.s32 4294967294, %s2095_s27   ;;  %s2095_s27 = sphi %s2146_s27, %s2827_s27   ;;  %s2091_s26 = sphi %s2144_s26, %s2826_s26   ;;  %s2087_s25 = sphi %s2142_s25, %s2825_s25   ;;  %s2083_s24 = sphi %s2140_s24, %s2824_s24  }
   0x4   : > { %s2165_s30 = sadd.s32 1, %s2095_s27   ;;  %s179_s8 = sadd.s32 1, %s2091_s26 }
   0x5   : > { %s176_s9 = ssub.s32 %s2095_s27, %s2165_s30  ;;  %p189_p0 = scmp.ne.s32.totalorder %s2091_s26, %s2087_s25 }
   0x6   : > { %p177_p1 = scmp.eq.s32.totalorder %s176_s9, 0  ;;  %p190_p2 = scmp.eq.s32.totalorder %s2161_s28, 1 }
   0x7   : > { %p195_p3 = scmp.ne.s32.totalorder %s2087_s25, %s2083_s24  ;;  %p196_p4 = scmp.eq.s32.totalorder %s1663_s29, 1 }
   0x8   : > { %s2176_s10 = scalar_select %p177_p1, %s2091_s26, %s179_s8  }
   0x9   : > { %p2178_p5 = por %p190_p2, %p189_p0  ;;  %p2182_p6 = por %p196_p4, %p195_p3 }
   0xa   : > { %p1666_p7 = scmp.ge.s32.totalorder %s2095_s27, 1  ;;  %p242_p8 = scmp.lt.s32.totalorder %s2095_s27, 3 }
   0xc   : > { %p243_p9 = pnand %p1666_p7, %p242_p8 }
   0xd   : > { %v1865_v0 = vld [vmem:[%s2815_s1 + $0x4] ss:$8 sps:$4 sm:$0xff] (!%p243_p9)   ;;  %v1867_v1 = vld [vmem:[%s2815_s1] ss:$8 sps:$4 sm:$0xff] (!%p243_p9)   ;;  %v1868_v2 = vld [vmem:[%s2815_s1 + $0x14] ss:$8 sps:$4 sm:$0xff] (!%p243_p9)  }
   0xe   : > { %246 = sbr.rel (%p243_p9) target bundleno = 818 (0x332), region = 48  ;;  %583 = vmatprep.subr.bf16.mxu0 (!%p243_p9), %v1865_v0  ;;  %v1870_v3 = vld [vmem:[%s2815_s1 + $0x10] ss:$8 sps:$4 sm:$0xff] (!%p243_p9)   ;;  %v1871_v4 = vld [vmem:[%s2815_s1 + $0x24] ss:$8 sps:$4 sm:$0xff] (!%p243_p9)   ;;  %s1668_s23 = sshll.u32 (!%p243_p9), %s2161_s28, 4 }
   0xf   : > { %584 = vmatpush1.bf16.msra.mxu0 (!%p243_p9), %v1867_v1  ;;  %v1873_v5 = vld [vmem:[%s2815_s1 + $0x20] ss:$8 sps:$4 sm:$0xff] (!%p243_p9)   ;;  %v1874_v6 = vld [vmem:[%s2815_s1 + $0x34] ss:$8 sps:$4 sm:$0xff] (!%p243_p9)   ;;  %p276_p10 = scmp.lt.s32.totalorder (!%p243_p9), %s1668_s23, 31  ;;  %s272_s13 = sand.u32 (!%p243_p9), 1, %s2087_s25  }
  0x10   : > { %585 = vmatprep.subr.bf16.mxu0 (!%p243_p9), %v1868_v2  ;;  %v1876_v7 = vld [vmem:[%s2815_s1 + $0x30] ss:$8 sps:$4 sm:$0xff] (!%p243_p9)   ;;  %v1877_v8 = vld [vmem:[%s2815_s1 + $0x44] ss:$8 sps:$4 sm:$0xff] (!%p243_p9)   ;;  %v1879_v9 = vld [vmem:[%s2815_s1 + $0x40] ss:$8 sps:$4 sm:$0xff] (!%p243_p9)  }
  0x11   : > { %v1880_v10 = vld [vmem:[%s2815_s1 + $0x54] ss:$8 sps:$4 sm:$0xff] (!%p243_p9)   ;;  %v1882_v11 = vld [vmem:[%s2815_s1 + $0x50] ss:$8 sps:$4 sm:$0xff] (!%p243_p9)   ;;  %v1883_v12 = vld [vmem:[%s2815_s1 + $0x64] ss:$8 sps:$4 sm:$0xff] (!%p243_p9)  }
  0x12   : > { %v1885_v14 = vld [vmem:[%s2815_s1 + $0x60] ss:$8 sps:$4 sm:$0xff] (!%p243_p9)   ;;  %v1886_v15 = vld [vmem:[%s2815_s1 + $0x74] ss:$8 sps:$4 sm:$0xff] (!%p243_p9)   ;;  %v1888_v16 = vld [vmem:[%s2815_s1 + $0x70] ss:$8 sps:$4 sm:$0xff] (!%p243_p9)  }
  0x13   : > { %586 = vmatpush1.bf16.msra.mxu0 (!%p243_p9), %v1870_v3  ;;  %v1889_v17 = vld [vmem:[%s2815_s1 + $0x84] ss:$8 sps:$4 sm:$0xff] (!%p243_p9)   ;;  %v1891_v18 = vld [vmem:[%s2815_s1 + $0x80] ss:$8 sps:$4 sm:$0xff] (!%p243_p9)   ;;  %v1892_v19 = vld [vmem:[%s2815_s1 + $0x94] ss:$8 sps:$4 sm:$0xff] (!%p243_p9)  }
  0x14   : > { %587 = vmatprep.subr.bf16.mxu0 (!%p243_p9), %v1871_v4  ;;  %v1937_v20 = vld [vmem:[%s2817_s3 + $0x4] ss:$8 sps:$4 sm:$0xff] (!%p243_p9)   ;;  %v1939_v21 = vld [vmem:[%s2817_s3] ss:$8 sps:$4 sm:$0xff] (!%p243_p9)   ;;  %v1894_v22 = vld [vmem:[%s2815_s1 + $0x90] ss:$8 sps:$4 sm:$0xff] (!%p243_p9)  }
  0x15   : > { %s2829_s23 = smov (!%p276_p10, %s1668_s23), 31  ;;  %980 = vmatprep.subr.bf16.mxu1 %v1937_v20  ;;  %v1940_v23 = vld [vmem:[%s2817_s3 + $0x14] ss:$8 sps:$4 sm:$0xff]   ;;  %v1895_v24 = vld [vmem:[%s2815_s1 + $0xa4] ss:$8 sps:$4 sm:$0xff]   ;;  %s1667_s15 = sshll.u32 %s272_s13, 8 }
  0x16   : > { %s1789_s22 = sshll.u32 %s2829_s23, 3  ;;  %981 = vmatpush1.bf16.msra.mxu1 %v1939_v21  ;;  %v1942_v25 = vld [vmem:[%s2817_s3 + $0x10] ss:$8 sps:$4 sm:$0xff]   ;;  %v1943_v26 = vld [vmem:[%s2817_s3 + $0x24] ss:$8 sps:$4 sm:$0xff]   ;;  %s2700_s16 = scalar_lea.vmem [#allocation2], %s1667_s15 }
  0x17   : > { %588 = vmatpush1.bf16.msra.mxu0 %v1873_v5  ;;  %s2228_s14 = scalar_lea.vmem %s2814_s0, %s1789_s22  ;;  %982 = vmatprep.subr.bf16.mxu1 %v1940_v23  ;;  %v1897_v27 = vld [vmem:[%s2815_s1 + $0xa0] ss:$8 sps:$4 sm:$0xff]   ;;  %v1898_v28 = vld [vmem:[%s2815_s1 + $0xb4] ss:$8 sps:$4 sm:$0xff]   ;;  %v1900_v31 = vld [vmem:[%s2815_s1 + $0xb0] ss:$8 sps:$4 sm:$0xff]  }
  0x18   : > { %589 = vmatprep.subr.bf16.mxu0 %v1874_v6  ;;  %v1915_v13 = vld [vmem:[%s2228_s14 + $0x4] ss:$8 sps:$4 sm:$0xff]   ;;  %v1945_v29 = vld [vmem:[%s2817_s3 + $0x20] ss:$8 sps:$4 sm:$0xff]   ;;  %v1946_v30 = vld [vmem:[%s2817_s3 + $0x34] ss:$8 sps:$4 sm:$0xff]  }
  0x19   : > { %615 = vmatprep.mubr.bf16.mxu0 %v1915_v13  ;;  %v1901_v32 = vld [vmem:[%s2815_s1 + $0xc4] ss:$8 sps:$4 sm:$0xff]   ;;  %v1948_v33 = vld [vmem:[%s2817_s3 + $0x30] ss:$8 sps:$4 sm:$0xff]   ;;  %v1903_v35 = vld [vmem:[%s2815_s1 + $0xc0] ss:$8 sps:$4 sm:$0xff]  }
  0x1a   : > { %983 = vmatpush1.bf16.msra.mxu1 %v1942_v25  ;;  %v1949_v34 = vld [vmem:[%s2817_s3 + $0x44] ss:$8 sps:$4 sm:$0xff]   ;;  %v1904_v36 = vld [vmem:[%s2815_s1 + $0xd4] ss:$8 sps:$4 sm:$0xff]   ;;  %v1951_v37 = vld [vmem:[%s2817_s3 + $0x40] ss:$8 sps:$4 sm:$0xff]  }
  0x1b   : > { %590 = vmatpush1.bf16.msra.mxu0 %v1876_v7  ;;  %984 = vmatprep.subr.bf16.mxu1 %v1943_v26  ;;  %v1952_v38 = vld [vmem:[%s2817_s3 + $0x54] ss:$8 sps:$4 sm:$0xff]   ;;  %v1906_v39 = vld [vmem:[%s2815_s1 + $0xd0] ss:$8 sps:$4 sm:$0xff]   ;;  %v1907_v41 = vld [vmem:[%s2815_s1 + $0xe4] ss:$8 sps:$4 sm:$0xff]  }
  0x1c   : > { %591 = vmatprep.subr.bf16.mxu0 %v1877_v8  ;;  %v1954_v40 = vld [vmem:[%s2817_s3 + $0x50] ss:$8 sps:$4 sm:$0xff]   ;;  %v1955_v42 = vld [vmem:[%s2817_s3 + $0x64] ss:$8 sps:$4 sm:$0xff]   ;;  %v1909_v43 = vld [vmem:[%s2815_s1 + $0xe0] ss:$8 sps:$4 sm:$0xff]  }
  0x1d   : > { %v1957_v44 = vld [vmem:[%s2817_s3 + $0x60] ss:$8 sps:$4 sm:$0xff]   ;;  %v1910_v45 = vld [vmem:[%s2815_s1 + $0xf4] ss:$8 sps:$4 sm:$0xff]   ;;  %v1912_v47 = vld [vmem:[%s2815_s1 + $0xf0] ss:$8 sps:$4 sm:$0xff]  }
  0x1e   : > { %985 = vmatpush1.bf16.msra.mxu1 %v1945_v29  ;;  %v1958_v46 = vld [vmem:[%s2817_s3 + $0x74] ss:$8 sps:$4 sm:$0xff]   ;;  %v1960_v48 = vld [vmem:[%s2817_s3 + $0x70] ss:$8 sps:$4 sm:$0xff]   ;;  %v1961_v49 = vld [vmem:[%s2817_s3 + $0x84] ss:$8 sps:$4 sm:$0xff]  }
  0x1f   : > { %592 = vmatpush1.bf16.msra.mxu0 %v1879_v9  ;;  %986 = vmatprep.subr.bf16.mxu1 %v1946_v30  ;;  %v1913_v50 = vld [vmem:[%s2228_s14] ss:$8 sps:$4 sm:$0xff]   ;;  %v1916_v51 = vld [vmem:[%s2228_s14 + $0x14] ss:$8 sps:$4 sm:$0xff]   ;;  %v1966_v54 = vld [vmem:[%s2817_s3 + $0x90] ss:$8 sps:$4 sm:$0xff]  }
  0x20   : > { %593 = vmatprep.subr.bf16.mxu0 %v1880_v10  ;;  %v1963_v52 = vld [vmem:[%s2817_s3 + $0x80] ss:$8 sps:$4 sm:$0xff]   ;;  %v1964_v53 = vld [vmem:[%s2817_s3 + $0x94] ss:$8 sps:$4 sm:$0xff]   ;;  %v1967_v55 = vld [vmem:[%s2817_s3 + $0xa4] ss:$8 sps:$4 sm:$0xff]  }
  0x21   : > { %v1918_v56 = vld [vmem:[%s2228_s14 + $0x10] ss:$8 sps:$4 sm:$0xff]   ;;  %v1919_v57 = vld [vmem:[%s2228_s14 + $0x24] ss:$8 sps:$4 sm:$0xff]   ;;  %v1969_v58 = vld [vmem:[%s2817_s3 + $0xa0] ss:$8 sps:$4 sm:$0xff]  }
  0x22   : > { %987 = vmatpush1.bf16.msra.mxu1 %v1948_v33  ;;  %v1970_v59 = vld [vmem:[%s2817_s3 + $0xb4] ss:$8 sps:$4 sm:$0xff]   ;;  %v1972_v60 = vld [vmem:[%s2817_s3 + $0xb0] ss:$8 sps:$4 sm:$0xff]   ;;  %v1973_v61 = vld [vmem:[%s2817_s3 + $0xc4] ss:$8 sps:$4 sm:$0xff]  }
  0x23   : > { %594 = vmatpush1.bf16.msra.mxu0 %v1882_v11  ;;  %988 = vmatprep.subr.bf16.mxu1 %v1949_v34  ;;  %v1921_v62 = vld [vmem:[%s2228_s14 + $0x20] ss:$8 sps:$4 sm:$0xff]   ;;  %v1922_v63 = vld [vmem:[%s2228_s14 + $0x34] ss:$8 sps:$4 sm:$0xff]   ;;  %v1924_v1 = vld [vmem:[%s2228_s14 + $0x30] ss:$8 sps:$4 sm:$0xff]  }
  0x24   : > { %595 = vmatprep.subr.bf16.mxu0 %v1883_v12  ;;  %v1975_v0 = vld [vmem:[%s2817_s3 + $0xc0] ss:$8 sps:$4 sm:$0xff]   ;;  %v1925_v2 = vld [vmem:[%s2228_s14 + $0x44] ss:$8 sps:$4 sm:$0xff]   ;;  %v1928_v4 = vld [vmem:[%s2228_s14 + $0x54] ss:$8 sps:$4 sm:$0xff]  }
  0x25   : > { %v1927_v3 = vld [vmem:[%s2228_s14 + $0x40] ss:$8 sps:$4 sm:$0xff]   ;;  %v1930_v5 = vld [vmem:[%s2228_s14 + $0x50] ss:$8 sps:$4 sm:$0xff]   ;;  %v1931_v6 = vld [vmem:[%s2228_s14 + $0x64] ss:$8 sps:$4 sm:$0xff]  }
  0x26   : > { %989 = vmatpush1.bf16.msra.mxu1 %v1951_v37  ;;  %v1933_v7 = vld [vmem:[%s2228_s14 + $0x60] ss:$8 sps:$4 sm:$0xff]   ;;  %v1934_v8 = vld [vmem:[%s2228_s14 + $0x74] ss:$8 sps:$4 sm:$0xff]   ;;  %v1936_v9 = vld [vmem:[%s2228_s14 + $0x70] ss:$8 sps:$4 sm:$0xff]  }
  0x27   : > { %596 = vmatpush1.bf16.msra.mxu0 %v1885_v14  ;;  %990 = vmatprep.subr.bf16.mxu1 %v1952_v38  ;;  %v1976_v10 = vld [vmem:[%s2817_s3 + $0xd4] ss:$8 sps:$4 sm:$0xff]   ;;  %v1978_v11 = vld [vmem:[%s2817_s3 + $0xd0] ss:$8 sps:$4 sm:$0xff]   ;;  %v1979_v12 = vld [vmem:[%s2817_s3 + $0xe4] ss:$8 sps:$4 sm:$0xff]  }
  0x28   : > { %597 = vmatprep.subr.bf16.mxu0 %v1886_v15  ;;  %v1981_v13 = vld [vmem:[%s2817_s3 + $0xe0] ss:$8 sps:$4 sm:$0xff]   ;;  %v1982_v14 = vld [vmem:[%s2817_s3 + $0xf4] ss:$8 sps:$4 sm:$0xff]   ;;  %v1984_v15 = vld [vmem:[%s2817_s3 + $0xf0] ss:$8 sps:$4 sm:$0xff]  }
  0x29   : > { %v2425_v20 = vld [vmem:[%s2819_s5 + $0x24] ss:$8 sps:$4 sm:$0xff]   ;;  %v2431_v21 = vld [vmem:[%s2819_s5 + $0x20] ss:$8 sps:$4 sm:$0xff]   ;;  %v2443_v23 = vld [vmem:[%s2819_s5 + $0x30] ss:$8 sps:$4 sm:$0xff]  }
  0x2a   : > { %991 = vmatpush1.bf16.msra.mxu1 %v1954_v40  ;;  %v2455_v25 = vld [vmem:[%s2819_s5 + $0x40] ss:$8 sps:$4 sm:$0xff]   ;;  %v2461_v26 = vld [vmem:[%s2819_s5 + $0x54] ss:$8 sps:$4 sm:$0xff]   ;;  %v333_v40 = vlaneseq  ;;  %s1791_s17 = sshll.u32 %s2161_s28, 12  ;;  %s1601_s23 = sshll.u32 %s2700_s16, 4  ;;  %s2766_s23 = int_to_ptr.vmem [resolvable:$true] %s1601_s23 }
  0x2b   : > { %598 = vmatpush1.bf16.msra.mxu0 %v1888_v16  ;;  %992 = vmatprep.subr.bf16.mxu1 %v1955_v42  ;;  %v2405_v16 = vld [vmem:[%s2819_s5] ss:$8 sps:$4 sm:$0xff]   ;;  %v2485_v30 = vld [vmem:[%s2819_s5 + $0x74] ss:$8 sps:$4 sm:$0xff]   ;;  %s2764_s20 = scalar_lea.hbm %s2821_s7, %s1791_s17  ;;  %s2773_s28 = scalar_lea.sflag [#allocation3], %s272_s13 }
  0x2c   : > { %599 = vmatprep.subr.bf16.mxu0 %v1889_v17  ;;  %v1987_v17 = vld [vmem:[%s2819_s5 + $0x4] ss:$8 sps:$4 sm:$0xff]   ;;  %v2479_v29 = vld [vmem:[%s2819_s5 + $0x60] ss:$8 sps:$4 sm:$0xff]   ;;  %v2509_v34 = vld [vmem:[%s2819_s5 + $0x94] ss:$8 sps:$4 sm:$0xff]  }
  0x2d   : > { %v2503_v33 = vld [vmem:[%s2819_s5 + $0x80] ss:$8 sps:$4 sm:$0xff]   ;;  %v2533_v38 = vld [vmem:[%s2819_s5 + $0xb4] ss:$8 sps:$4 sm:$0xff]   ;;  %s2033_s21 = scalar_lea.vmem %s2766_s23, 4096  ;;  %s2097_s22 = smov [#allocation2]  }
  0x2e   : > { %993 = vmatpush1.bf16.msra.mxu1 %v1957_v44  ;;  %v2527_v37 = vld [vmem:[%s2819_s5 + $0xa0] ss:$8 sps:$4 sm:$0xff]   ;;  %p2034_p11 = scmp.ne.s32.totalorder %s2766_s23, %s2033_s21  ;;  %s2037_s14 = sshll.u32 %s2097_s22, 4  ;;  %s2038_s14 = int_to_ptr.vmem [resolvable:$false] %s2037_s14 }
  0x2f   : > { %600 = vmatpush1.bf16.msra.mxu0 %v1891_v18  ;;  %994 = vmatprep.subr.bf16.mxu1 %v1958_v46  ;;  %v2413_v18 = vld [vmem:[%s2819_s5 + $0x14] ss:$8 sps:$4 sm:$0xff]   ;;  %v2551_v42 = vld [vmem:[%s2819_s5 + $0xc0] ss:$8 sps:$4 sm:$0xff]   ;;  %s2039_s29 = scalar_lea.vmem %s2038_s14, 8192  ;;  %p2040_p0 = scmp.lt.s32.totalorder %s2766_s23, %s2038_s14 }
  0x30   : > { %601 = vmatprep.subr.bf16.mxu0 %v1892_v19  ;;  %v2419_v19 = vld [vmem:[%s2819_s5 + $0x10] ss:$8 sps:$4 sm:$0xff]   ;;  %p2035_p12 = pnand %p2034_p11, %p2178_p5  ;;  %p2041_p1 = scmp.lt.s32.totalorder %s2039_s29, %s2033_s21 }
  0x32   : > { %995 = vmatpush1.bf16.msra.mxu1 %v1960_v48  ;;  %p2036_p13 = pneg %p2035_p12  ;;  %p2042_p2 = por %p2041_p1, %p2040_p0 }
  0x33   : > { %602 = vmatpush1.bf16.msra.mxu0 %v1894_v22  ;;  %996 = vmatprep.subr.bf16.mxu1 %v1961_v49  ;;  %v2437_v22 = vld [vmem:[%s2819_s5 + $0x34] ss:$8 sps:$4 sm:$0xff]  }
  0x34   : > { %603 = vmatprep.subr.bf16.mxu0 %v1895_v24  ;;  %v2449_v24 = vld [vmem:[%s2819_s5 + $0x44] ss:$8 sps:$4 sm:$0xff]   ;;  %p2043_p3 = pnand %p2042_p2, %p2036_p13 }
  0x36   : > { %997 = vmatpush1.bf16.msra.mxu1 %v1963_v52 }
  0x37   : > { %604 = vmatpush1.bf16.msra.mxu0 %v1897_v27  ;;  %998 = vmatprep.subr.bf16.mxu1 %v1964_v53  ;;  %v2467_v27 = vld [vmem:[%s2819_s5 + $0x50] ss:$8 sps:$4 sm:$0xff]  }
  0x38   : > { %605 = vmatprep.subr.bf16.mxu0 %v1898_v28  ;;  %v2473_v28 = vld [vmem:[%s2819_s5 + $0x64] ss:$8 sps:$4 sm:$0xff]  }
  0x3a   : > { %999 = vmatpush1.bf16.msra.mxu1 %v1966_v54 }
  0x3b   : > { %606 = vmatpush1.bf16.msra.mxu0 %v1900_v31  ;;  %1000 = vmatprep.subr.bf16.mxu1 %v1967_v55  ;;  %v2491_v31 = vld [vmem:[%s2819_s5 + $0x70] ss:$8 sps:$4 sm:$0xff]  }
  0x3c   : > { %607 = vmatprep.subr.bf16.mxu0 %v1901_v32  ;;  %v2497_v32 = vld [vmem:[%s2819_s5 + $0x84] ss:$8 sps:$4 sm:$0xff]  }
  0x3e   : > { %1001 = vmatpush1.bf16.msra.mxu1 %v1969_v58 }
  0x3f   : > { %608 = vmatpush1.bf16.msra.mxu0 %v1903_v35  ;;  %1002 = vmatprep.subr.bf16.mxu1 %v1970_v59  ;;  %v2515_v35 = vld [vmem:[%s2819_s5 + $0x90] ss:$8 sps:$4 sm:$0xff]  }
  0x40   : > { %609 = vmatprep.subr.bf16.mxu0 %v1904_v36  ;;  %v2521_v36 = vld [vmem:[%s2819_s5 + $0xa4] ss:$8 sps:$4 sm:$0xff]  }
  0x42   : > { %1003 = vmatpush1.bf16.msra.mxu1 %v1972_v60 }
  0x43   : > { %610 = vmatpush1.bf16.msra.mxu0 %v1906_v39  ;;  %1004 = vmatprep.subr.bf16.mxu1 %v1973_v61  ;;  %v2539_v39 = vld [vmem:[%s2819_s5 + $0xb0] ss:$8 sps:$4 sm:$0xff]  }
  0x44   : > { %611 = vmatprep.subr.bf16.mxu0 %v1907_v41  ;;  %v2545_v41 = vld [vmem:[%s2819_s5 + $0xc4] ss:$8 sps:$4 sm:$0xff]  }
  0x46   : > { %1005 = vmatpush1.bf16.msra.mxu1 %v1975_v0 }
  0x47   : > { %612 = vmatpush1.bf16.msra.mxu0 %v1909_v43  ;;  %1006 = vmatprep.subr.bf16.mxu1 %v1976_v10  ;;  %v334_v43 = vshrl.u32 %v333_v40, 7 }
  0x48   : > { %613 = vmatprep.subr.bf16.mxu0 %v1910_v45  ;;  %v331_v45 = vld [vmem:[%s2816_s2] sm:$0x3] }
  0x49   : > { %v2555_v44 = vsub.s32 0, %v334_v43  ;;  %v2560_v46 = vsub.s32 1, %v334_v43 }
  0x4a   : > { %1007 = vmatpush1.bf16.msra.mxu1 %v1978_v11 }
  0x4b   : > { %614 = vmatpush1.bf16.msra.mxu0 %v1912_v47  ;;  %1008 = vmatprep.subr.bf16.mxu1 %v1979_v12  ;;  %v2563_v47 = vrot.slane %v331_v45, %v2555_v44  ;;  %v2566_v48 = vrot.slane %v331_v45, %v2560_v46 }
  0x4c   : > { %1377 = vmatprep.subr.bf16.mxu0 %v1987_v17 }
  0x4e   : > { %616 = vmatmul.mubr.bf16.vlgmr.msra.gmra.mrb[0].mxu0 %v1913_v50  ;;  %1009 = vmatpush1.bf16.msra.mxu1 %v1981_v13 }
  0x4f   : > { %625 = vmatprep.mubr.bf16.mxu0 %v1916_v51  ;;  %1010 = vmatprep.subr.bf16.mxu1 %v1982_v14 }
  0x50   : > { %1378 = vmatpush1.bf16.msra.mxu0 %v2405_v16 }
  0x51   : > { %1379 = vmatprep.subr.bf16.mxu0 %v2413_v18 }
  0x52   : > { %1011 = vmatpush1.bf16.msra.mxu1 %v1984_v15 }
  0x53   : > { %1792 = vmatprep.subr.bf16.mxu1 %v1987_v17 }
  0x54   : > { %1380 = vmatpush1.bf16.msra.mxu0 %v2419_v19 }
  0x55   : > { %1381 = vmatprep.subr.bf16.mxu0 %v2425_v20 }
  0x56   : > { %626 = vmatmul.mubr.bf16.gmra.mrb[4].mxu0 %v1918_v56 }
  0x57   : > { %635 = vmatprep.mubr.bf16.mxu0 %v1919_v57 }
  0x58   : > { %1382 = vmatpush1.bf16.msra.mxu0 %v2431_v21 }
  0x59   : > { %1383 = vmatprep.subr.bf16.mxu0 %v2437_v22 }
  0x5c   : > { %1384 = vmatpush1.bf16.msra.mxu0 %v2443_v23 }
  0x5d   : > { %1385 = vmatprep.subr.bf16.mxu0 %v2449_v24 }
  0x5e   : > { %636 = vmatmul.mubr.bf16.gmra.mrb[8].mxu0 %v1921_v62 }
  0x5f   : > { %645 = vmatprep.mubr.bf16.mxu0 %v1922_v63 }
  0x60   : > { %1386 = vmatpush1.bf16.msra.mxu0 %v2455_v25 }
  0x61   : > { %1387 = vmatprep.subr.bf16.mxu0 %v2461_v26 }
  0x64   : > { %1388 = vmatpush1.bf16.msra.mxu0 %v2467_v27 }
  0x65   : > { %1389 = vmatprep.subr.bf16.mxu0 %v2473_v28 }
  0x66   : > { %646 = vmatmul.mubr.bf16.gmra.mrb[12].mxu0 %v1924_v1 }
  0x67   : > { %655 = vmatprep.mubr.bf16.mxu0 %v1925_v2 }
  0x68   : > { %1390 = vmatpush1.bf16.msra.mxu0 %v2479_v29 }
  0x69   : > { %1391 = vmatprep.subr.bf16.mxu0 %v2485_v30 }
  0x6c   : > { %1392 = vmatpush1.bf16.msra.mxu0 %v2491_v31 }
  0x6d   : > { %1393 = vmatprep.subr.bf16.mxu0 %v2497_v32 }
  0x6e   : > { %656 = vmatmul.mubr.bf16.gmra.mrb[16].mxu0 %v1927_v3 }
  0x6f   : > { %665 = vmatprep.mubr.bf16.mxu0 %v1928_v4 }
  0x70   : > { %1394 = vmatpush1.bf16.msra.mxu0 %v2503_v33 }
  0x71   : > { %1395 = vmatprep.subr.bf16.mxu0 %v2509_v34 }
  0x74   : > { %1396 = vmatpush1.bf16.msra.mxu0 %v2515_v35 }
  0x75   : > { %1397 = vmatprep.subr.bf16.mxu0 %v2521_v36 }
  0x76   : > { %666 = vmatmul.mubr.bf16.gmra.mrb[20].mxu0 %v1930_v5 }
  0x77   : > { %675 = vmatprep.mubr.bf16.mxu0 %v1931_v6 }
  0x78   : > { %1398 = vmatpush1.bf16.msra.mxu0 %v2527_v37 }
  0x79   : > { %1399 = vmatprep.subr.bf16.mxu0 %v2533_v38 }
  0x7c   : > { %1400 = vmatpush1.bf16.msra.mxu0 %v2539_v39 }
  0x7d   : > { %1401 = vmatprep.subr.bf16.mxu0 %v2545_v41 }
  0x7e   : > { %676 = vmatmul.mubr.bf16.gmra.mrb[24].mxu0 %v1933_v7 }
  0x7f   : > { %685 = vmatprep.mubr.bf16.mxu0 %v1934_v8 }
  0x80   : > { %1402 = vmatpush1.bf16.msra.mxu0 %v2551_v42 }
  0x86   : > { %686 = vmatmul.mubr.bf16.gmra.mrb[28].mxu0 %v1936_v9 }
 0x121   : > { %v617_v49 = vpop.f32.mrb[0].mxu0 }
 0x122   : > { %v618_v50 = vadd.f32 %v617_v49, %v2563_v47  ;;  %v619_v51 = vpop.f32.mrb[1].mxu0 }
 0x123   : > { %v620_v52 = vadd.f32 %v619_v51, %v2566_v48  ;;  %v621_v53 = vpop.f32.mrb[2].mxu0 }
 0x124   : > { %v696_v54 = vmul.f32 0.01, %v618_v50  ;;  %v622_v55 = vadd.f32 %v621_v53, %v2563_v47  ;;  %v623_v56 = vpop.f32.mrb[3].mxu0 }
 0x125   : > { %v697_v57 = vmul.f32 0.01, %v620_v52  ;;  %v624_v58 = vadd.f32 %v623_v56, %v2566_v48 }
 0x126   : > { %v698_v59 = vmul.f32 0.01, %v622_v55  ;;  %v728_v61 = vmax.f32 %v618_v50, %v696_v54 }
 0x127   : > { %v699_v60 = vmul.f32 0.01, %v624_v58  ;;  %v729_v0 = vmax.f32 %v620_v52, %v697_v57 }
 0x128   : > { %v730_v62 = vmax.f32 %v622_v55, %v698_v59 }
 0x129   : > { %v627_v63 = vpop.f32.mrb[4].mxu0  ;;  %v731_v1 = vmax.f32 %v624_v58, %v699_v60 }
 0x12a   : > { %v628_v2 = vadd.f32 %v627_v63, %v2563_v47  ;;  %v629_v3 = vpop.f32.mrb[5].mxu0  ;;  %v760_v4 = vpack.c.bf16 %v730_v62, %v728_v61 }
 0x12b   : > { %v630_v5 = vadd.f32 %v629_v3, %v2566_v48  ;;  %v631_v6 = vpop.f32.mrb[6].mxu0  ;;  %v761_v7 = vpack.c.bf16 %v731_v1, %v729_v0 }
 0x12c   : > { %v700_v8 = vmul.f32 0.01, %v628_v2  ;;  %v632_v9 = vadd.f32 %v631_v6, %v2563_v47  ;;  %v633_v10 = vpop.f32.mrb[7].mxu0 }
 0x12d   : > { %v701_v11 = vmul.f32 0.01, %v630_v5  ;;  %v634_v12 = vadd.f32 %v633_v10, %v2566_v48  ;;  %1012 = vmatprep.mubr.bf16.mxu1 %v761_v7 }
 0x12e   : > { %v702_v13 = vmul.f32 0.01, %v632_v9  ;;  %1013 = vmatmul.mubr.bf16.vlgmr.msra.gmra.mrb[0].mxu1 %v760_v4  ;;  %v732_v15 = vmax.f32 %v628_v2, %v700_v8 }
 0x12f   : > { %v703_v14 = vmul.f32 0.01, %v634_v12  ;;  %1808 = vmatpush1.bf16.msra.mxu1 %v2405_v16  ;;  %v733_v40 = vmax.f32 %v630_v5, %v701_v11 }
 0x130   : > { %v734_v17 = vmax.f32 %v632_v9, %v702_v13  ;;  %1793 = vmatprep.subr.bf16.mxu1 %v2413_v18 }
 0x131   : > { %v735_v43 = vmax.f32 %v634_v12, %v703_v14  ;;  %v637_v45 = vpop.f32.mrb[8].mxu0 }
 0x132   : > { %v638_v49 = vadd.f32 %v637_v45, %v2563_v47  ;;  %v639_v50 = vpop.f32.mrb[9].mxu0  ;;  %v762_v51 = vpack.c.bf16 %v734_v17, %v732_v15 }
 0x133   : > { %v640_v52 = vadd.f32 %v639_v50, %v2566_v48  ;;  %v641_v53 = vpop.f32.mrb[10].mxu0  ;;  %v763_v54 = vpack.c.bf16 %v735_v43, %v733_v40  ;;  %1809 = vmatpush1.bf16.msra.mxu1 %v2419_v19 }
 0x134   : > { %v704_v55 = vmul.f32 0.01, %v638_v49  ;;  %v642_v16 = vadd.f32 %v641_v53, %v2563_v47  ;;  %v643_v56 = vpop.f32.mrb[11].mxu0  ;;  %1794 = vmatprep.subr.bf16.mxu1 %v2425_v20 }
 0x135   : > { %v705_v18 = vmul.f32 0.01, %v640_v52  ;;  %v644_v57 = vadd.f32 %v643_v56, %v2566_v48  ;;  %1022 = vmatprep.mubr.bf16.mxu1 %v763_v54 }
 0x136   : > { %v706_v58 = vmul.f32 0.01, %v642_v16  ;;  %1023 = vmatmul.mubr.bf16.gmra.mrb[4].mxu1 %v762_v51  ;;  %v736_v60 = vmax.f32 %v638_v49, %v704_v55 }
 0x137   : > { %v707_v59 = vmul.f32 0.01, %v644_v57  ;;  %1810 = vmatpush1.bf16.msra.mxu1 %v2431_v21  ;;  %v737_v19 = vmax.f32 %v640_v52, %v705_v18 }
 0x138   : > { %v738_v61 = vmax.f32 %v642_v16, %v706_v58  ;;  %1795 = vmatprep.subr.bf16.mxu1 %v2437_v22 }
 0x139   : > { %v739_v62 = vmax.f32 %v644_v57, %v707_v59  ;;  %v647_v63 = vpop.f32.mrb[12].mxu0 }
 0x13a   : > { %v648_v0 = vadd.f32 %v647_v63, %v2563_v47  ;;  %v649_v1 = vpop.f32.mrb[13].mxu0  ;;  %v764_v20 = vpack.c.bf16 %v738_v61, %v736_v60 }
 0x13b   : > { %v650_v2 = vadd.f32 %v649_v1, %v2566_v48  ;;  %v651_v3 = vpop.f32.mrb[14].mxu0  ;;  %v765_v4 = vpack.c.bf16 %v739_v62, %v737_v19  ;;  %1811 = vmatpush1.bf16.msra.mxu1 %v2443_v23 }
 0x13c   : > { %v708_v5 = vmul.f32 0.01, %v648_v0  ;;  %v652_v21 = vadd.f32 %v651_v3, %v2563_v47  ;;  %v653_v6 = vpop.f32.mrb[15].mxu0  ;;  %1796 = vmatprep.subr.bf16.mxu1 %v2449_v24 }
 0x13d   : > { %v709_v22 = vmul.f32 0.01, %v650_v2  ;;  %v654_v7 = vadd.f32 %v653_v6, %v2566_v48  ;;  %1032 = vmatprep.mubr.bf16.mxu1 %v765_v4 }
 0x13e   : > { %v710_v8 = vmul.f32 0.01, %v652_v21  ;;  %1033 = vmatmul.mubr.bf16.gmra.mrb[8].mxu1 %v764_v20  ;;  %v740_v10 = vmax.f32 %v648_v0, %v708_v5 }
 0x13f   : > { %v711_v9 = vmul.f32 0.01, %v654_v7  ;;  %1812 = vmatpush1.bf16.msra.mxu1 %v2455_v25  ;;  %v741_v23 = vmax.f32 %v650_v2, %v709_v22 }
 0x140   : > { %v742_v11 = vmax.f32 %v652_v21, %v710_v8  ;;  %1797 = vmatprep.subr.bf16.mxu1 %v2461_v26 }
 0x141   : > { %v743_v12 = vmax.f32 %v654_v7, %v711_v9  ;;  %v657_v13 = vpop.f32.mrb[16].mxu0 }
 0x142   : > { %v658_v14 = vadd.f32 %v657_v13, %v2563_v47  ;;  %v659_v15 = vpop.f32.mrb[17].mxu0  ;;  %v766_v24 = vpack.c.bf16 %v742_v11, %v740_v10 }
 0x143   : > { %v660_v17 = vadd.f32 %v659_v15, %v2566_v48  ;;  %v661_v40 = vpop.f32.mrb[18].mxu0  ;;  %v767_v43 = vpack.c.bf16 %v743_v12, %v741_v23  ;;  %1813 = vmatpush1.bf16.msra.mxu1 %v2467_v27 }
 0x144   : > { %v712_v45 = vmul.f32 0.01, %v658_v14  ;;  %v662_v25 = vadd.f32 %v661_v40, %v2563_v47  ;;  %v663_v49 = vpop.f32.mrb[19].mxu0  ;;  %1798 = vmatprep.subr.bf16.mxu1 %v2473_v28 }
 0x145   : > { %v713_v26 = vmul.f32 0.01, %v660_v17  ;;  %v664_v50 = vadd.f32 %v663_v49, %v2566_v48  ;;  %1042 = vmatprep.mubr.bf16.mxu1 %v767_v43 }
 0x146   : > { %v714_v51 = vmul.f32 0.01, %v662_v25  ;;  %1043 = vmatmul.mubr.bf16.gmra.mrb[12].mxu1 %v766_v24  ;;  %v744_v53 = vmax.f32 %v658_v14, %v712_v45 }
 0x147   : > { %v715_v52 = vmul.f32 0.01, %v664_v50  ;;  %1814 = vmatpush1.bf16.msra.mxu1 %v2479_v29  ;;  %v745_v27 = vmax.f32 %v660_v17, %v713_v26 }
 0x148   : > { %v746_v54 = vmax.f32 %v662_v25, %v714_v51  ;;  %1799 = vmatprep.subr.bf16.mxu1 %v2485_v30 }
 0x149   : > { %v747_v55 = vmax.f32 %v664_v50, %v715_v52  ;;  %v667_v16 = vpop.f32.mrb[20].mxu0 }
 0x14a   : > { %v668_v56 = vadd.f32 %v667_v16, %v2563_v47  ;;  %v669_v18 = vpop.f32.mrb[21].mxu0  ;;  %v768_v28 = vpack.c.bf16 %v746_v54, %v744_v53  ;;  %v808_v16 = vld [vmem:[%s2818_s4] sm:$0x3] }
 0x14b   : > { %v670_v57 = vadd.f32 %v669_v18, %v2566_v48  ;;  %v671_v58 = vpop.f32.mrb[22].mxu0  ;;  %v769_v59 = vpack.c.bf16 %v747_v55, %v745_v27  ;;  %1815 = vmatpush1.bf16.msra.mxu1 %v2491_v31  ;;  %v2032_v27 = vld [vmem:[%s2819_s5 + $0xf4] ss:$8 sps:$4 sm:$0xff]   ;;  %v2030_v55 = vld [vmem:[%s2819_s5 + $0xf0] ss:$8 sps:$4 sm:$0xff]   ;;  %v2650_v18 = vrot.slane %v808_v16, %v2560_v46 }
 0x14c   : > { %v716_v60 = vmul.f32 0.01, %v668_v56  ;;  %v672_v29 = vadd.f32 %v671_v58, %v2563_v47  ;;  %v673_v61 = vpop.f32.mrb[23].mxu0  ;;  %1800 = vmatprep.subr.bf16.mxu1 %v2497_v32 }
 0x14d   : > { %v717_v30 = vmul.f32 0.01, %v670_v57  ;;  %v674_v19 = vadd.f32 %v673_v61, %v2566_v48  ;;  %1052 = vmatprep.mubr.bf16.mxu1 %v769_v59 }
 0x14e   : > { %v718_v62 = vmul.f32 0.01, %v672_v29  ;;  %1053 = vmatmul.mubr.bf16.gmra.mrb[16].mxu1 %v768_v28  ;;  %v748_v0 = vmax.f32 %v668_v56, %v716_v60  ;;  %v2647_v56 = vrot.slane %v808_v16, %v2555_v44 }
 0x14f   : > { %v719_v63 = vmul.f32 0.01, %v674_v19  ;;  %1816 = vmatpush1.bf16.msra.mxu1 %v2503_v33  ;;  %v749_v31 = vmax.f32 %v670_v57, %v717_v30 }
 0x150   : > { %v750_v1 = vmax.f32 %v672_v29, %v718_v62  ;;  %1801 = vmatprep.subr.bf16.mxu1 %v2509_v34 }
 0x151   : > { %v751_v20 = vmax.f32 %v674_v19, %v719_v63  ;;  %v677_v2 = vpop.f32.mrb[24].mxu0 }
 0x152   : > { %v678_v3 = vadd.f32 %v677_v2, %v2563_v47  ;;  %v679_v4 = vpop.f32.mrb[25].mxu0  ;;  %v770_v32 = vpack.c.bf16 %v750_v1, %v748_v0 }
 0x153   : > { %v680_v5 = vadd.f32 %v679_v4, %v2566_v48  ;;  %v681_v21 = vpop.f32.mrb[26].mxu0  ;;  %v771_v6 = vpack.c.bf16 %v751_v20, %v749_v31  ;;  %1817 = vmatpush1.bf16.msra.mxu1 %v2515_v35 }
 0x154   : > { %v720_v22 = vmul.f32 0.01, %v678_v3  ;;  %v682_v33 = vadd.f32 %v681_v21, %v2563_v47  ;;  %v683_v7 = vpop.f32.mrb[27].mxu0  ;;  %1802 = vmatprep.subr.bf16.mxu1 %v2521_v36 }
 0x155   : > { %v721_v34 = vmul.f32 0.01, %v680_v5  ;;  %v684_v8 = vadd.f32 %v683_v7, %v2566_v48  ;;  %1062 = vmatprep.mubr.bf16.mxu1 %v771_v6 }
 0x156   : > { %v722_v9 = vmul.f32 0.01, %v682_v33  ;;  %1063 = vmatmul.mubr.bf16.gmra.mrb[20].mxu1 %v770_v32  ;;  %v752_v11 = vmax.f32 %v678_v3, %v720_v22 }
 0x157   : > { %v723_v10 = vmul.f32 0.01, %v684_v8  ;;  %1818 = vmatpush1.bf16.msra.mxu1 %v2527_v37  ;;  %v753_v35 = vmax.f32 %v680_v5, %v721_v34 }
 0x158   : > { %v754_v23 = vmax.f32 %v682_v33, %v722_v9  ;;  %1803 = vmatprep.subr.bf16.mxu1 %v2533_v38 }
 0x159   : > { %v755_v12 = vmax.f32 %v684_v8, %v723_v10  ;;  %v687_v13 = vpop.f32.mrb[28].mxu0 }
 0x15a   : > { %v688_v14 = vadd.f32 %v687_v13, %v2563_v47  ;;  %v689_v15 = vpop.f32.mrb[29].mxu0  ;;  %v772_v36 = vpack.c.bf16 %v754_v23, %v752_v11 }
 0x15b   : > { %v690_v24 = vadd.f32 %v689_v15, %v2566_v48  ;;  %v691_v17 = vpop.f32.mrb[30].mxu0  ;;  %v773_v40 = vpack.c.bf16 %v755_v12, %v753_v35  ;;  %1819 = vmatpush1.bf16.msra.mxu1 %v2539_v39 }
 0x15c   : > { %v724_v43 = vmul.f32 0.01, %v688_v14  ;;  %v692_v37 = vadd.f32 %v691_v17, %v2563_v47  ;;  %v693_v45 = vpop.f32.mrb[31].mxu0  ;;  %1804 = vmatprep.subr.bf16.mxu1 %v2545_v41  ;;  %v2026_v41 = vld [vmem:[%s2819_s5 + $0xd4] ss:$8 sps:$4 sm:$0xff]  }
 0x15d   : > { %v725_v38 = vmul.f32 0.01, %v690_v24  ;;  %v694_v25 = vadd.f32 %v693_v45, %v2566_v48  ;;  %1072 = vmatprep.mubr.bf16.mxu1 %v773_v40  ;;  %v2024_v47 = vld [vmem:[%s2819_s5 + $0xd0] ss:$8 sps:$4 sm:$0xff]   ;;  %1403 = vmatprep.subr.bf16.mxu0 %v2026_v41  ;;  %v2027_v48 = vld [vmem:[%s2819_s5 + $0xe0] ss:$8 sps:$4 sm:$0xff]  }
 0x15e   : > { %v726_v49 = vmul.f32 0.01, %v692_v37  ;;  %1073 = vmatmul.mubr.bf16.gmra.mrb[24].mxu1 %v772_v36  ;;  %v756_v50 = vmax.f32 %v688_v14, %v724_v43  ;;  %1404 = vmatpush1.bf16.msra.mxu0 %v2024_v47 }
 0x15f   : > { %v727_v26 = vmul.f32 0.01, %v694_v25  ;;  %1820 = vmatpush1.bf16.msra.mxu1 %v2551_v42  ;;  %v757_v52 = vmax.f32 %v690_v24, %v725_v38  ;;  %v2029_v42 = vld [vmem:[%s2819_s5 + $0xe4] ss:$8 sps:$4 sm:$0xff]  }
 0x160   : > { %v758_v51 = vmax.f32 %v692_v37, %v726_v49  ;;  %1805 = vmatprep.subr.bf16.mxu1 %v2026_v41  ;;  %1405 = vmatprep.subr.bf16.mxu0 %v2029_v42 }
 0x161   : > { %v759_v53 = vmax.f32 %v694_v25, %v727_v26 }
 0x162   : > { %v774_v39 = vpack.c.bf16 %v758_v51, %v756_v50  ;;  %1406 = vmatpush1.bf16.msra.mxu0 %v2027_v48 }
 0x163   : > { %v775_v54 = vpack.c.bf16 %v759_v53, %v757_v52  ;;  %1821 = vmatpush1.bf16.msra.mxu1 %v2024_v47  ;;  %1407 = vmatprep.subr.bf16.mxu0 %v2032_v27 }
 0x164   : > { %1806 = vmatprep.subr.bf16.mxu1 %v2029_v42 }
 0x165   : > { %1082 = vmatprep.mubr.bf16.mxu1 %v775_v54 }
 0x166   : > { %1083 = vmatmul.mubr.bf16.gmra.mrb[28].mxu1 %v774_v39  ;;  %1408 = vmatpush1.bf16.msra.mxu0 %v2030_v55 }
 0x167   : > { %1822 = vmatpush1.bf16.msra.mxu1 %v2027_v48 }
 0x168   : > { %1807 = vmatprep.subr.bf16.mxu1 %v2032_v27 }
 0x16b   : > { %1823 = vmatpush1.bf16.msra.mxu1 %v2030_v55 }
 0x201   : > { %v1014_v28 = vpop.f32.mrb[0].mxu1 }
 0x202   : > { %v1015_v57 = vadd.f32 %v1014_v28, %v2647_v56  ;;  %v1016_v58 = vpop.f32.mrb[1].mxu1 }
 0x203   : > { %v1017_v59 = vadd.f32 %v1016_v58, %v2650_v18  ;;  %v1018_v60 = vpop.f32.mrb[2].mxu1 }
 0x204   : > { %v1093_v29 = vmul.f32 0.01, %v1015_v57  ;;  %v1019_v61 = vadd.f32 %v1018_v60, %v2647_v56  ;;  %v1020_v30 = vpop.f32.mrb[3].mxu1 }
 0x205   : > { %v1094_v19 = vmul.f32 0.01, %v1017_v59  ;;  %v1021_v62 = vadd.f32 %v1020_v30, %v2650_v18 }
 0x206   : > { %v1095_v63 = vmul.f32 0.01, %v1019_v61  ;;  %v1125_v1 = vmax.f32 %v1015_v57, %v1093_v29 }
 0x207   : > { %v1096_v0 = vmul.f32 0.01, %v1021_v62  ;;  %v1126_v20 = vmax.f32 %v1017_v59, %v1094_v19 }
 0x208   : > { %v1127_v31 = vmax.f32 %v1019_v61, %v1095_v63 }
 0x209   : > { %v1128_v2 = vmax.f32 %v1021_v62, %v1096_v0  ;;  %v1024_v3 = vpop.f32.mrb[4].mxu1 }
 0x20a   : > { %v1157_v4 = vpack.c.bf16 %v1127_v31, %v1125_v1  ;;  %v1025_v32 = vadd.f32 %v1024_v3, %v2647_v56  ;;  %v1026_v5 = vpop.f32.mrb[5].mxu1 }
 0x20b   : > { %v1027_v21 = vadd.f32 %v1026_v5, %v2650_v18  ;;  %v1028_v6 = vpop.f32.mrb[6].mxu1  ;;  %v1158_v22 = vpack.c.bf16 %v1128_v2, %v1126_v20 }
 0x20c   : > { %v1097_v33 = vmul.f32 0.01, %v1025_v32  ;;  %v1029_v7 = vadd.f32 %v1028_v6, %v2647_v56  ;;  %v1030_v34 = vpop.f32.mrb[7].mxu1 }
 0x20d   : > { %v1098_v8 = vmul.f32 0.01, %v1027_v21  ;;  %v1031_v9 = vadd.f32 %v1030_v34, %v2650_v18  ;;  %1409 = vmatprep.mubr.bf16.mxu0 %v1158_v22 }
 0x20e   : > { %v1099_v10 = vmul.f32 0.01, %v1029_v7  ;;  %1410 = vmatmul.mubr.bf16.vlgmr.msra.gmra.mrb[32].mxu0 %v1157_v4  ;;  %v1129_v23 = vmax.f32 %v1025_v32, %v1097_v33 }
 0x20f   : > { %v1100_v11 = vmul.f32 0.01, %v1031_v9  ;;  %v1130_v12 = vmax.f32 %v1027_v21, %v1098_v8 }
 0x210   : > { %v1131_v35 = vmax.f32 %v1029_v7, %v1099_v10 }
 0x211   : > { %v1132_v13 = vmax.f32 %v1031_v9, %v1100_v11  ;;  %v1034_v14 = vpop.f32.mrb[8].mxu1 }
 0x212   : > { %v1035_v15 = vadd.f32 %v1034_v14, %v2647_v56  ;;  %v1036_v36 = vpop.f32.mrb[9].mxu1  ;;  %v1159_v24 = vpack.c.bf16 %v1131_v35, %v1129_v23 }
 0x213   : > { %v1037_v17 = vadd.f32 %v1036_v36, %v2650_v18  ;;  %v1038_v40 = vpop.f32.mrb[10].mxu1  ;;  %v1160_v43 = vpack.c.bf16 %v1132_v13, %v1130_v12 }
 0x214   : > { %v1101_v37 = vmul.f32 0.01, %v1035_v15  ;;  %v1039_v45 = vadd.f32 %v1038_v40, %v2647_v56  ;;  %v1040_v38 = vpop.f32.mrb[11].mxu1 }
 0x215   : > { %v1102_v25 = vmul.f32 0.01, %v1037_v17  ;;  %v1041_v49 = vadd.f32 %v1040_v38, %v2650_v18  ;;  %1419 = vmatprep.mubr.bf16.mxu0 %v1160_v43 }
 0x216   : > { %v1103_v26 = vmul.f32 0.01, %v1039_v45  ;;  %1420 = vmatmul.mubr.bf16.gmra.mrb[36].mxu0 %v1159_v24  ;;  %v1133_v51 = vmax.f32 %v1035_v15, %v1101_v37 }
 0x217   : > { %v1104_v50 = vmul.f32 0.01, %v1041_v49  ;;  %v1134_v53 = vmax.f32 %v1037_v17, %v1102_v25 }
 0x218   : > { %v1135_v52 = vmax.f32 %v1039_v45, %v1103_v26 }
 0x219   : > { %v1136_v39 = vmax.f32 %v1041_v49, %v1104_v50  ;;  %v1044_v54 = vpop.f32.mrb[12].mxu1 }
 0x21a   : > { %v1045_v41 = vadd.f32 %v1044_v54, %v2647_v56  ;;  %v1046_v47 = vpop.f32.mrb[13].mxu1  ;;  %v1161_v42 = vpack.c.bf16 %v1135_v52, %v1133_v51 }
 0x21b   : > { %v1047_v48 = vadd.f32 %v1046_v47, %v2650_v18  ;;  %v1048_v27 = vpop.f32.mrb[14].mxu1  ;;  %v1162_v55 = vpack.c.bf16 %v1136_v39, %v1134_v53 }
 0x21c   : > { %v1105_v16 = vmul.f32 0.01, %v1045_v41  ;;  %v1049_v28 = vadd.f32 %v1048_v27, %v2647_v56  ;;  %v1050_v57 = vpop.f32.mrb[15].mxu1 }
 0x21d   : > { %v1106_v58 = vmul.f32 0.01, %v1047_v48  ;;  %v1051_v59 = vadd.f32 %v1050_v57, %v2650_v18  ;;  %1429 = vmatprep.mubr.bf16.mxu0 %v1162_v55 }
 0x21e   : > { %v1107_v60 = vmul.f32 0.01, %v1049_v28  ;;  %1430 = vmatmul.mubr.bf16.gmra.mrb[40].mxu0 %v1161_v42  ;;  %v1137_v61 = vmax.f32 %v1045_v41, %v1105_v16 }
 0x21f   : > { %v1108_v29 = vmul.f32 0.01, %v1051_v59  ;;  %v1138_v19 = vmax.f32 %v1047_v48, %v1106_v58 }
 0x220   : > { %v1139_v30 = vmax.f32 %v1049_v28, %v1107_v60 }
 0x221   : > { %v1140_v62 = vmax.f32 %v1051_v59, %v1108_v29  ;;  %v1054_v63 = vpop.f32.mrb[16].mxu1 }
 0x222   : > { %v1055_v0 = vadd.f32 %v1054_v63, %v2647_v56  ;;  %v1056_v1 = vpop.f32.mrb[17].mxu1  ;;  %v1163_v31 = vpack.c.bf16 %v1139_v30, %v1137_v61 }
 0x223   : > { %v1057_v20 = vadd.f32 %v1056_v1, %v2650_v18  ;;  %v1058_v2 = vpop.f32.mrb[18].mxu1  ;;  %v1164_v3 = vpack.c.bf16 %v1140_v62, %v1138_v19 }
 0x224   : > { %v1109_v4 = vmul.f32 0.01, %v1055_v0  ;;  %v1059_v32 = vadd.f32 %v1058_v2, %v2647_v56  ;;  %v1060_v5 = vpop.f32.mrb[19].mxu1 }
 0x225   : > { %v1110_v21 = vmul.f32 0.01, %v1057_v20  ;;  %v1061_v6 = vadd.f32 %v1060_v5, %v2650_v18  ;;  %1439 = vmatprep.mubr.bf16.mxu0 %v1164_v3 }
 0x226   : > { %v1111_v22 = vmul.f32 0.01, %v1059_v32  ;;  %1440 = vmatmul.mubr.bf16.gmra.mrb[44].mxu0 %v1163_v31  ;;  %v1141_v7 = vmax.f32 %v1055_v0, %v1109_v4 }
 0x227   : > { %v1112_v33 = vmul.f32 0.01, %v1061_v6  ;;  %v1142_v8 = vmax.f32 %v1057_v20, %v1110_v21 }
 0x228   : > { %v1143_v34 = vmax.f32 %v1059_v32, %v1111_v22 }
 0x229   : > { %v1144_v9 = vmax.f32 %v1061_v6, %v1112_v33  ;;  %v1064_v10 = vpop.f32.mrb[20].mxu1 }
 0x22a   : > { %v1165_v11 = vpack.c.bf16 %v1143_v34, %v1141_v7  ;;  %v1065_v23 = vadd.f32 %v1064_v10, %v2647_v56  ;;  %v1066_v35 = vpop.f32.mrb[21].mxu1 }
 0x22b   : > { %v1067_v12 = vadd.f32 %v1066_v35, %v2650_v18  ;;  %v1068_v13 = vpop.f32.mrb[22].mxu1  ;;  %v1166_v14 = vpack.c.bf16 %v1144_v9, %v1142_v8 }
 0x22c   : > { %v1113_v15 = vmul.f32 0.01, %v1065_v23  ;;  %v1069_v36 = vadd.f32 %v1068_v13, %v2647_v56  ;;  %v1070_v24 = vpop.f32.mrb[23].mxu1 }
 0x22d   : > { %v1114_v17 = vmul.f32 0.01, %v1067_v12  ;;  %v1071_v40 = vadd.f32 %v1070_v24, %v2650_v18  ;;  %1449 = vmatprep.mubr.bf16.mxu1 %v1166_v14 }
 0x22e   : > { %v1115_v43 = vmul.f32 0.01, %v1069_v36  ;;  %1450 = vmatmul.mubr.bf16.vlgmr.msra.gmra.mrb[32].mxu1 %v1165_v11  ;;  %v1145_v45 = vmax.f32 %v1065_v23, %v1113_v15 }
 0x22f   : > { %v1116_v37 = vmul.f32 0.01, %v1071_v40  ;;  %v1146_v25 = vmax.f32 %v1067_v12, %v1114_v17 }
 0x230   : > { %v1147_v38 = vmax.f32 %v1069_v36, %v1115_v43 }
 0x231   : > { %v1148_v49 = vmax.f32 %v1071_v40, %v1116_v37  ;;  %v1074_v26 = vpop.f32.mrb[24].mxu1 }
 0x232   : > { %v1075_v50 = vadd.f32 %v1074_v26, %v2647_v56  ;;  %v1076_v51 = vpop.f32.mrb[25].mxu1  ;;  %v1167_v52 = vpack.c.bf16 %v1147_v38, %v1145_v45 }
 0x233   : > { %v1077_v53 = vadd.f32 %v1076_v51, %v2650_v18  ;;  %v1078_v39 = vpop.f32.mrb[26].mxu1  ;;  %v1168_v54 = vpack.c.bf16 %v1148_v49, %v1146_v25 }
 0x234   : > { %v1117_v41 = vmul.f32 0.01, %v1075_v50  ;;  %v1079_v47 = vadd.f32 %v1078_v39, %v2647_v56  ;;  %v1080_v42 = vpop.f32.mrb[27].mxu1 }
 0x235   : > { %v1118_v48 = vmul.f32 0.01, %v1077_v53  ;;  %v1081_v27 = vadd.f32 %v1080_v42, %v2650_v18  ;;  %1459 = vmatprep.mubr.bf16.mxu1 %v1168_v54 }
 0x236   : > { %v1119_v55 = vmul.f32 0.01, %v1079_v47  ;;  %1460 = vmatmul.mubr.bf16.gmra.mrb[36].mxu1 %v1167_v52  ;;  %v1149_v28 = vmax.f32 %v1075_v50, %v1117_v41 }
 0x237   : > { %v1120_v16 = vmul.f32 0.01, %v1081_v27  ;;  %v1150_v58 = vmax.f32 %v1077_v53, %v1118_v48 }
 0x238   : > { %v1151_v57 = vmax.f32 %v1079_v47, %v1119_v55 }
 0x239   : > { %v1152_v59 = vmax.f32 %v1081_v27, %v1120_v16  ;;  %v1084_v60 = vpop.f32.mrb[28].mxu1 }
 0x23a   : > { %v1085_v29 = vadd.f32 %v1084_v60, %v2647_v56  ;;  %v1086_v61 = vpop.f32.mrb[29].mxu1  ;;  %v1169_v30 = vpack.c.bf16 %v1151_v57, %v1149_v28 }
 0x23b   : > { %v1087_v19 = vadd.f32 %v1086_v61, %v2650_v18  ;;  %v1088_v62 = vpop.f32.mrb[30].mxu1  ;;  %v1170_v63 = vpack.c.bf16 %v1152_v59, %v1150_v58 }
 0x23c   : > { %v1121_v0 = vmul.f32 0.01, %v1085_v29  ;;  %v1089_v1 = vadd.f32 %v1088_v62, %v2647_v56  ;;  %v1090_v31 = vpop.f32.mrb[31].mxu1  ;;  %v1205_v56 = vld [vmem:[%s2820_s6] sm:$0x3] }
 0x23d   : > { %v1122_v20 = vmul.f32 0.01, %v1087_v19  ;;  %v1091_v2 = vadd.f32 %v1090_v31, %v2650_v18  ;;  %1469 = vmatprep.mubr.bf16.mxu1 %v1170_v63  ;;  %v2688_v7 = vrot.slane %v1205_v56, %v2555_v44  ;;  %v2692_v18 = vrot.slane %v1205_v56, %v2560_v46 }
 0x23e   : > { %v1123_v3 = vmul.f32 0.01, %v1089_v1  ;;  %1470 = vmatmul.mubr.bf16.gmra.mrb[40].mxu1 %v1169_v30  ;;  %v1153_v32 = vmax.f32 %v1085_v29, %v1121_v0 }
 0x23f   : > { %v1124_v4 = vmul.f32 0.01, %v1091_v2  ;;  %v1154_v21 = vmax.f32 %v1087_v19, %v1122_v20 }
 0x240   : > { %v1155_v5 = vmax.f32 %v1089_v1, %v1123_v3 }
 0x241   : > { %v1156_v6 = vmax.f32 %v1091_v2, %v1124_v4 }
 0x242   : > { %v1171_v22 = vpack.c.bf16 %v1155_v5, %v1153_v32 }
 0x243   : > { %v1172_v33 = vpack.c.bf16 %v1156_v6, %v1154_v21 }
 0x245   : > { %1479 = vmatprep.mubr.bf16.mxu1 %v1172_v33 }
 0x246   : > { %1480 = vmatmul.mubr.bf16.gmra.mrb[44].mxu1 %v1171_v22 }
 0x2e1   : > { %v1411_v34 = vpop.f32.mrb[32].mxu0 }
 0x2e2   : > { %v1412_v8 = vadd.f32 %v1411_v34, %v2688_v7  ;;  %v1413_v9 = vpop.f32.mrb[33].mxu0 }
 0x2e3   : > { %v1414_v10 = vadd.f32 %v1413_v9, %v2692_v18  ;;  %v1415_v11 = vpop.f32.mrb[34].mxu0 }
 0x2e4   : > { %v1490_v23 = vmul.f32 0.01, %v1412_v8  ;;  %v1416_v35 = vadd.f32 %v1415_v11, %v2688_v7  ;;  %v1417_v12 = vpop.f32.mrb[35].mxu0 }
 0x2e5   : > { %v1491_v13 = vmul.f32 0.01, %v1414_v10  ;;  %v1418_v44 = vadd.f32 %v1417_v12, %v2692_v18 }
 0x2e6   : > { %v1522_v14 = vmax.f32 %v1412_v8, %v1490_v23  ;;  %v1492_v15 = vmul.f32 0.01, %v1416_v35 }
 0x2e7   : > { %v1523_v46 = vmax.f32 %v1414_v10, %v1491_v13  ;;  %v1493_v36 = vmul.f32 0.01, %v1418_v44 }
 0x2e8   : > { %1554 = vst [vmem:[%s2700_s16] sm:$0xff] %v1522_v14  ;;  %v1524_v24 = vmax.f32 %v1416_v35, %v1492_v15 }
 0x2e9   : > { %1555 = vst [vmem:[%s2700_s16 + $0x8] sm:$0xff] %v1523_v46  ;;  %v1525_v17 = vmax.f32 %v1418_v44, %v1493_v36  ;;  %v1421_v40 = vpop.f32.mrb[36].mxu0 }
 0x2ea   : > { %1556 = vst [vmem:[%s2700_s16 + $0x10] sm:$0xff] %v1524_v24  ;;  %v1422_v43 = vadd.f32 %v1421_v40, %v2688_v7  ;;  %v1423_v37 = vpop.f32.mrb[37].mxu0 }
 0x2eb   : > { %1557 = vst [vmem:[%s2700_s16 + $0x18] sm:$0xff] %v1525_v17  ;;  %v1424_v45 = vadd.f32 %v1423_v37, %v2692_v18  ;;  %v1425_v38 = vpop.f32.mrb[38].mxu0 }
 0x2ec   : > { %v1494_v25 = vmul.f32 0.01, %v1422_v43  ;;  %v1426_v49 = vadd.f32 %v1425_v38, %v2688_v7  ;;  %v1427_v26 = vpop.f32.mrb[39].mxu0 }
 0x2ed   : > { %v1495_v50 = vmul.f32 0.01, %v1424_v45  ;;  %v1428_v51 = vadd.f32 %v1427_v26, %v2692_v18 }
 0x2ee   : > { %v1526_v52 = vmax.f32 %v1422_v43, %v1494_v25  ;;  %v1496_v53 = vmul.f32 0.01, %v1426_v49 }
 0x2ef   : > { %v1527_v39 = vmax.f32 %v1424_v45, %v1495_v50  ;;  %v1497_v54 = vmul.f32 0.01, %v1428_v51 }
 0x2f0   : > { %1558 = vst [vmem:[%s2700_s16 + $0x20] sm:$0xff] %v1526_v52  ;;  %v1528_v41 = vmax.f32 %v1426_v49, %v1496_v53 }
 0x2f1   : > { %1559 = vst [vmem:[%s2700_s16 + $0x28] sm:$0xff] %v1527_v39  ;;  %v1529_v47 = vmax.f32 %v1428_v51, %v1497_v54  ;;  %v1431_v42 = vpop.f32.mrb[40].mxu0 }
 0x2f2   : > { %1560 = vst [vmem:[%s2700_s16 + $0x30] sm:$0xff] %v1528_v41  ;;  %v1432_v48 = vadd.f32 %v1431_v42, %v2688_v7  ;;  %v1433_v27 = vpop.f32.mrb[41].mxu0 }
 0x2f3   : > { %1561 = vst [vmem:[%s2700_s16 + $0x38] sm:$0xff] %v1529_v47  ;;  %v1434_v55 = vadd.f32 %v1433_v27, %v2692_v18  ;;  %v1435_v16 = vpop.f32.mrb[42].mxu0 }
 0x2f4   : > { %v1498_v28 = vmul.f32 0.01, %v1432_v48  ;;  %v1436_v57 = vadd.f32 %v1435_v16, %v2688_v7  ;;  %v1437_v58 = vpop.f32.mrb[43].mxu0 }
 0x2f5   : > { %v1499_v59 = vmul.f32 0.01, %v1434_v55  ;;  %v1438_v60 = vadd.f32 %v1437_v58, %v2692_v18 }
 0x2f6   : > { %v1530_v29 = vmax.f32 %v1432_v48, %v1498_v28  ;;  %v1500_v61 = vmul.f32 0.01, %v1436_v57 }
 0x2f7   : > { %v1531_v30 = vmax.f32 %v1434_v55, %v1499_v59  ;;  %v1501_v19 = vmul.f32 0.01, %v1438_v60 }
 0x2f8   : > { %1562 = vst [vmem:[%s2700_s16 + $0x40] sm:$0xff] %v1530_v29  ;;  %v1532_v62 = vmax.f32 %v1436_v57, %v1500_v61 }
 0x2f9   : > { %1563 = vst [vmem:[%s2700_s16 + $0x48] sm:$0xff] %v1531_v30  ;;  %v1533_v63 = vmax.f32 %v1438_v60, %v1501_v19  ;;  %v1441_v0 = vpop.f32.mrb[44].mxu0 }
 0x2fa   : > { %1564 = vst [vmem:[%s2700_s16 + $0x50] sm:$0xff] %v1532_v62  ;;  %v1442_v1 = vadd.f32 %v1441_v0, %v2688_v7  ;;  %v1443_v31 = vpop.f32.mrb[45].mxu0 }
 0x2fb   : > { %1565 = vst [vmem:[%s2700_s16 + $0x58] sm:$0xff] %v1533_v63  ;;  %v1444_v20 = vadd.f32 %v1443_v31, %v2692_v18  ;;  %v1445_v2 = vpop.f32.mrb[46].mxu0 }
 0x2fc   : > { %v1502_v3 = vmul.f32 0.01, %v1442_v1  ;;  %v1446_v4 = vadd.f32 %v1445_v2, %v2688_v7  ;;  %v1447_v32 = vpop.f32.mrb[47].mxu0 }
 0x2fd   : > { %v1503_v5 = vmul.f32 0.01, %v1444_v20  ;;  %v1448_v21 = vadd.f32 %v1447_v32, %v2692_v18 }
 0x2fe   : > { %v1534_v6 = vmax.f32 %v1442_v1, %v1502_v3  ;;  %v1504_v22 = vmul.f32 0.01, %v1446_v4 }
 0x2ff   : > { %v1535_v33 = vmax.f32 %v1444_v20, %v1503_v5  ;;  %v1505_v56 = vmul.f32 0.01, %v1448_v21 }
 0x300   : > { %1566 = vst [vmem:[%s2700_s16 + $0x60] sm:$0xff] %v1534_v6  ;;  %v1536_v34 = vmax.f32 %v1446_v4, %v1504_v22 }
 0x301   : > { %1567 = vst [vmem:[%s2700_s16 + $0x68] sm:$0xff] %v1535_v33  ;;  %v1537_v8 = vmax.f32 %v1448_v21, %v1505_v56  ;;  %v1451_v9 = vpop.f32.mrb[32].mxu1 }
 0x302   : > { %1568 = vst [vmem:[%s2700_s16 + $0x70] sm:$0xff] %v1536_v34  ;;  %v1452_v10 = vadd.f32 %v1451_v9, %v2688_v7  ;;  %v1453_v11 = vpop.f32.mrb[33].mxu1 }
 0x303   : > { %1569 = vst [vmem:[%s2700_s16 + $0x78] sm:$0xff] %v1537_v8  ;;  %v1454_v23 = vadd.f32 %v1453_v11, %v2692_v18  ;;  %v1455_v35 = vpop.f32.mrb[34].mxu1 }
 0x304   : > { %v1506_v12 = vmul.f32 0.01, %v1452_v10  ;;  %v1456_v13 = vadd.f32 %v1455_v35, %v2688_v7  ;;  %v1457_v44 = vpop.f32.mrb[35].mxu1 }
 0x305   : > { %v1507_v14 = vmul.f32 0.01, %v1454_v23  ;;  %v1458_v15 = vadd.f32 %v1457_v44, %v2692_v18 }
 0x306   : > { %v1538_v46 = vmax.f32 %v1452_v10, %v1506_v12  ;;  %v1508_v36 = vmul.f32 0.01, %v1456_v13 }
 0x307   : > { %v1539_v24 = vmax.f32 %v1454_v23, %v1507_v14  ;;  %v1509_v17 = vmul.f32 0.01, %v1458_v15 }
 0x308   : > { %1570 = vst [vmem:[%s2700_s16 + $0x80] sm:$0xff] %v1538_v46  ;;  %v1540_v40 = vmax.f32 %v1456_v13, %v1508_v36 }
 0x309   : > { %1571 = vst [vmem:[%s2700_s16 + $0x88] sm:$0xff] %v1539_v24  ;;  %v1541_v43 = vmax.f32 %v1458_v15, %v1509_v17  ;;  %v1461_v37 = vpop.f32.mrb[36].mxu1 }
 0x30a   : > { %1572 = vst [vmem:[%s2700_s16 + $0x90] sm:$0xff] %v1540_v40  ;;  %v1462_v45 = vadd.f32 %v1461_v37, %v2688_v7  ;;  %v1463_v38 = vpop.f32.mrb[37].mxu1 }
 0x30b   : > { %1573 = vst [vmem:[%s2700_s16 + $0x98] sm:$0xff] %v1541_v43  ;;  %v1464_v25 = vadd.f32 %v1463_v38, %v2692_v18  ;;  %v1465_v49 = vpop.f32.mrb[38].mxu1 }
 0x30c   : > { %v1510_v26 = vmul.f32 0.01, %v1462_v45  ;;  %v1466_v50 = vadd.f32 %v1465_v49, %v2688_v7  ;;  %v1467_v51 = vpop.f32.mrb[39].mxu1 }
 0x30d   : > { %v1511_v52 = vmul.f32 0.01, %v1464_v25  ;;  %v1468_v53 = vadd.f32 %v1467_v51, %v2692_v18 }
 0x30e   : > { %v1542_v39 = vmax.f32 %v1462_v45, %v1510_v26  ;;  %v1512_v54 = vmul.f32 0.01, %v1466_v50 }
 0x30f   : > { %v1543_v41 = vmax.f32 %v1464_v25, %v1511_v52  ;;  %v1513_v47 = vmul.f32 0.01, %v1468_v53 }
 0x310   : > { %1574 = vst [vmem:[%s2700_s16 + $0xa0] sm:$0xff] %v1542_v39  ;;  %v1544_v42 = vmax.f32 %v1466_v50, %v1512_v54 }
 0x311   : > { %1575 = vst [vmem:[%s2700_s16 + $0xa8] sm:$0xff] %v1543_v41  ;;  %v1545_v48 = vmax.f32 %v1468_v53, %v1513_v47  ;;  %v1471_v27 = vpop.f32.mrb[40].mxu1 }
 0x312   : > { %1576 = vst [vmem:[%s2700_s16 + $0xb0] sm:$0xff] %v1544_v42  ;;  %v1472_v55 = vadd.f32 %v1471_v27, %v2688_v7  ;;  %v1473_v16 = vpop.f32.mrb[41].mxu1 }
 0x313   : > { %1577 = vst [vmem:[%s2700_s16 + $0xb8] sm:$0xff] %v1545_v48  ;;  %v1474_v28 = vadd.f32 %v1473_v16, %v2692_v18  ;;  %v1475_v57 = vpop.f32.mrb[42].mxu1 }
 0x314   : > { %v1514_v58 = vmul.f32 0.01, %v1472_v55  ;;  %v1476_v59 = vadd.f32 %v1475_v57, %v2688_v7  ;;  %v1477_v60 = vpop.f32.mrb[43].mxu1 }
 0x315   : > { %v1515_v29 = vmul.f32 0.01, %v1474_v28  ;;  %v1478_v61 = vadd.f32 %v1477_v60, %v2692_v18 }
 0x316   : > { %v1546_v30 = vmax.f32 %v1472_v55, %v1514_v58  ;;  %v1516_v19 = vmul.f32 0.01, %v1476_v59 }
 0x317   : > { %v1547_v62 = vmax.f32 %v1474_v28, %v1515_v29  ;;  %v1517_v63 = vmul.f32 0.01, %v1478_v61 }
 0x318   : > { %1578 = vst [vmem:[%s2700_s16 + $0xc0] sm:$0xff] %v1546_v30  ;;  %v1548_v0 = vmax.f32 %v1476_v59, %v1516_v19 }
 0x319   : > { %1579 = vst [vmem:[%s2700_s16 + $0xc8] sm:$0xff] %v1547_v62  ;;  %v1549_v1 = vmax.f32 %v1478_v61, %v1517_v63  ;;  %v1481_v31 = vpop.f32.mrb[44].mxu1 }
 0x31a   : > { %1580 = vst [vmem:[%s2700_s16 + $0xd0] sm:$0xff] %v1548_v0  ;;  %v1482_v20 = vadd.f32 %v1481_v31, %v2688_v7  ;;  %v1483_v2 = vpop.f32.mrb[45].mxu1 }
 0x31b   : > { %1581 = vst [vmem:[%s2700_s16 + $0xd8] sm:$0xff] %v1549_v1  ;;  %v1484_v3 = vadd.f32 %v1483_v2, %v2692_v18  ;;  %v1485_v4 = vpop.f32.mrb[46].mxu1 }
 0x31c   : > { %v1518_v32 = vmul.f32 0.01, %v1482_v20  ;;  %v1486_v5 = vadd.f32 %v1485_v4, %v2688_v7  ;;  %v1487_v21 = vpop.f32.mrb[47].mxu1 }
 0x31d   : > { %v1519_v6 = vmul.f32 0.01, %v1484_v3  ;;  %v1488_v22 = vadd.f32 %v1487_v21, %v2692_v18 }
 0x31e   : > { %v1550_v33 = vmax.f32 %v1482_v20, %v1518_v32  ;;  %v1520_v56 = vmul.f32 0.01, %v1486_v5 }
 0x31f   : > { %v1551_v34 = vmax.f32 %v1484_v3, %v1519_v6  ;;  %v1521_v8 = vmul.f32 0.01, %v1488_v22 }
 0x320   : > { %1582 = vst [vmem:[%s2700_s16 + $0xe0] sm:$0xff] %v1550_v33  ;;  %v1552_v9 = vmax.f32 %v1486_v5, %v1520_v56 }
 0x321   : > { %1583 = vst [vmem:[%s2700_s16 + $0xe8] sm:$0xff] %v1551_v34  ;;  %v1553_v7 = vmax.f32 %v1488_v22, %v1521_v8 }
 0x322   : > { %1584 = vst [vmem:[%s2700_s16 + $0xf0] sm:$0xff] %v1552_v9 }
 0x323   : > { %1585 = vst [vmem:[%s2700_s16 + $0xf8] sm:$0xff] %v1553_v7 }
 0x324   : > { %2046 = shalt.err (!%p2043_p3)
}
 0x325   : > { %s2047_s8 = scalar_lea.hbm %s2764_s20, 4096  ;;  %s2051_s15 = scalar_lea.hbm %s2821_s7, 8192 }
 0x326   : > { %p2048_p4 = scmp.ne.s32.totalorder %s2764_s20, %s2047_s8  ;;  %p2052_p9 = scmp.lt.u32.totalorder %s2764_s20, %s2821_s7 }
 0x327   : > { %p2053_p10 = scmp.lt.u32.totalorder %s2051_s15, %s2047_s8  ;;  %p2055_p12 = scmp.lt.u32.totalorder %s2047_s8, %s2764_s20 }
 0x328   : > { %p2049_p7 = pnand %p2048_p4, %p2178_p5 }
 0x329   : > { %p2054_p11 = por %p2053_p10, %p2052_p9 }
 0x32a   : > { %p2050_p8 = pneg %p2049_p7 }
 0x32b   : > { %p2056_p13 = por %p2055_p12, %p2054_p11 }
 0x32d   : > { %p2057_p0 = pnand %p2056_p13, %p2050_p8 }
 0x32f   : > { %2060 = shalt.err (!%p2057_p0)
}
 0x330   : > { %s2098_s18 = smov 256   ;;  %s2099_s19 = smov 16  }
 0x331   : > { %1824 = dma.vmem_to_hbm [thread:$0]  (%p2178_p5), %s2766_s23, 4096, %s2764_s20, %s2773_s28, %s2098_s18, %s2098_s18, %s2099_s19  }
 0x332 PF: > { %p1830_p1 = scmp.ge.s32.totalorder %s2095_s27, 2  ;;  %s1616_s21 = sand.u32 1, %s2083_s24  }
 0x333   : > { %s1617_s22 = scalar_lea.sflag [#allocation3], %s1616_s21 }
 0x334   : > { %p1827_p2 = pnand %p1830_p1, %p2182_p6 }
 0x336   : > { %2078 = dma.done.wait (!%p1827_p2), %s1617_s22, 4096  }
 0x337   : > { %2080 = vsyncadd (!%p1827_p2), %s1617_s22, 4294963200  ;;  %p17_p3 = scmp.ge.s32.totalorder %s2165_s30, 4   ;;  %s2824_s24 = smov %s2087_s25 }
 0x338   : > { %s2825_s25 = smov %s2091_s26  ;;  %s2826_s26 = smov %s2176_s10 }
 0x339   : > { %s2827_s27 = smov %s2165_s30  ;;  %19 = sbr.rel (!%p17_p3) target bundleno = 3 (0x3), region = 83 }
 0x340   :  { %1622 = vsyncpa [#allocation3], 1 }
 0x341   :  { %1624 = vsyncpa [#allocation3 + $0x1], 1 }

// kernel: _forward_impl.1
= control target key start
LH: loop header
LB: loop body
LE: loop exit
PB: predicated region body
PF: predicated region fallthrough
CT: control target
= control target key end

     0   :  { %12 = vsyncpa [#allocation3], 0  ;;  %s2814_s0 = inlined_call_operand.vmem [shape: bf16[256,256], index: 0, kind: input, shape index: {}]   ;;  %s2815_s1 = inlined_call_operand.vmem [shape: bf16[256,256], index: 1, kind: input, shape index: {}]   ;;  %s2816_s2 = inlined_call_operand.vmem [shape: f32[1,256], index: 2, kind: input, shape index: {}]   ;;  %s2817_s3 = inlined_call_operand.vmem [shape: bf16[256,256], index: 3, kind: input, shape index: {}]   ;;  %s2818_s4 = inlined_call_operand.vmem [shape: f32[1,256], index: 4, kind: input, shape index: {}]   ;;  %s2819_s5 = inlined_call_operand.vmem [shape: bf16[256,256], index: 5, kind: input, shape index: {}]   ;;  %s2820_s6 = inlined_call_operand.vmem [shape: f32[1,256], index: 6, kind: input, shape index: {}]   ;;  %s2821_s7 = inlined_call_operand.hbm [shape: f32[256,256], index: 7, kind: output, shape index: {}]  }
   0x1   :  { %14 = vsyncpa [#allocation3 + $0x1], 0  ;;  %s2140_s24 = smov 0   ;;  %s2142_s25 = smov 0  }
   0x2   :  { %s2144_s26 = smov 0   ;;  %s2146_s27 = smov 0  }
   0x3 LB: > { %s2161_s28 = sadd.s32 4294967295, %s2095_s27   ;;  %s1663_s29 = sadd.s32 4294967294, %s2095_s27   ;;  %s2095_s27 = sphi %s2146_s27, %s2827_s27   ;;  %s2091_s26 = sphi %s2144_s26, %s2826_s26   ;;  %s2087_s25 = sphi %s2142_s25, %s2825_s25   ;;  %s2083_s24 = sphi %s2140_s24, %s2824_s24  }
   0x4   : > { %s2165_s30 = sadd.s32 1, %s2095_s27   ;;  %s179_s8 = sadd.s32 1, %s2091_s26 }
   0x5   : > { %s176_s9 = ssub.s32 %s2095_s27, %s2165_s30  ;;  %p189_p0 = scmp.ne.s32.totalorder %s2091_s26, %s2087_s25 }
   0x6   : > { %p177_p1 = scmp.eq.s32.totalorder %s176_s9, 0  ;;  %p190_p2 = scmp.eq.s32.totalorder %s2161_s28, 1 }
   0x7   : > { %p195_p3 = scmp.ne.s32.totalorder %s2087_s25, %s2083_s24  ;;  %p196_p4 = scmp.eq.s32.totalorder %s1663_s29, 1 }
   0x8   : > { %s2176_s10 = scalar_select %p177_p1, %s2091_s26, %s179_s8  }
   0x9   : > { %p2178_p5 = por %p190_p2, %p189_p0  ;;  %p2182_p6 = por %p196_p4, %p195_p3 }
   0xa   : > { %p1666_p7 = scmp.ge.s32.totalorder %s2095_s27, 1  ;;  %p242_p8 = scmp.lt.s32.totalorder %s2095_s27, 3 }
   0xc   : > { %p243_p9 = pnand %p1666_p7, %p242_p8 }
   0xd   : > { %v1865_v0 = vld [vmem:[%s2815_s1 + $0x4] ss:$8 sps:$4 sm:$0xff] (!%p243_p9)   ;;  %v1867_v1 = vld [vmem:[%s2815_s1] ss:$8 sps:$4 sm:$0xff] (!%p243_p9)   ;;  %v1868_v2 = vld [vmem:[%s2815_s1 + $0x14] ss:$8 sps:$4 sm:$0xff] (!%p243_p9)  }
   0xe   : > { %246 = sbr.rel (%p243_p9) target bundleno = 818 (0x332), region = 48  ;;  %583 = vmatprep.subr.bf16.mxu0 (!%p243_p9), %v1865_v0  ;;  %v1870_v3 = vld [vmem:[%s2815_s1 + $0x10] ss:$8 sps:$4 sm:$0xff] (!%p243_p9)   ;;  %v1871_v4 = vld [vmem:[%s2815_s1 + $0x24] ss:$8 sps:$4 sm:$0xff] (!%p243_p9)   ;;  %s1668_s23 = sshll.u32 (!%p243_p9), %s2161_s28, 4 }
   0xf   : > { %584 = vmatpush1.bf16.msra.mxu0 (!%p243_p9), %v1867_v1  ;;  %v1873_v5 = vld [vmem:[%s2815_s1 + $0x20] ss:$8 sps:$4 sm:$0xff] (!%p243_p9)   ;;  %v1874_v6 = vld [vmem:[%s2815_s1 + $0x34] ss:$8 sps:$4 sm:$0xff] (!%p243_p9)   ;;  %p276_p10 = scmp.lt.s32.totalorder (!%p243_p9), %s1668_s23, 31  ;;  %s272_s13 = sand.u32 (!%p243_p9), 1, %s2087_s25  }
  0x10   : > { %585 = vmatprep.subr.bf16.mxu0 (!%p243_p9), %v1868_v2  ;;  %v1876_v7 = vld [vmem:[%s2815_s1 + $0x30] ss:$8 sps:$4 sm:$0xff] (!%p243_p9)   ;;  %v1877_v8 = vld [vmem:[%s2815_s1 + $0x44] ss:$8 sps:$4 sm:$0xff] (!%p243_p9)   ;;  %v1879_v9 = vld [vmem:[%s2815_s1 + $0x40] ss:$8 sps:$4 sm:$0xff] (!%p243_p9)  }
  0x11   : > { %v1880_v10 = vld [vmem:[%s2815_s1 + $0x54] ss:$8 sps:$4 sm:$0xff] (!%p243_p9)   ;;  %v1882_v11 = vld [vmem:[%s2815_s1 + $0x50] ss:$8 sps:$4 sm:$0xff] (!%p243_p9)   ;;  %v1883_v12 = vld [vmem:[%s2815_s1 + $0x64] ss:$8 sps:$4 sm:$0xff] (!%p243_p9)  }
  0x12   : > { %v1885_v14 = vld [vmem:[%s2815_s1 + $0x60] ss:$8 sps:$4 sm:$0xff] (!%p243_p9)   ;;  %v1886_v15 = vld [vmem:[%s2815_s1 + $0x74] ss:$8 sps:$4 sm:$0xff] (!%p243_p9)   ;;  %v1888_v16 = vld [vmem:[%s2815_s1 + $0x70] ss:$8 sps:$4 sm:$0xff] (!%p243_p9)  }
  0x13   : > { %586 = vmatpush1.bf16.msra.mxu0 (!%p243_p9), %v1870_v3  ;;  %v1889_v17 = vld [vmem:[%s2815_s1 + $0x84] ss:$8 sps:$4 sm:$0xff] (!%p243_p9)   ;;  %v1891_v18 = vld [vmem:[%s2815_s1 + $0x80] ss:$8 sps:$4 sm:$0xff] (!%p243_p9)   ;;  %v1892_v19 = vld [vmem:[%s2815_s1 + $0x94] ss:$8 sps:$4 sm:$0xff] (!%p243_p9)  }
  0x14   : > { %587 = vmatprep.subr.bf16.mxu0 (!%p243_p9), %v1871_v4  ;;  %v1937_v20 = vld [vmem:[%s2817_s3 + $0x4] ss:$8 sps:$4 sm:$0xff] (!%p243_p9)   ;;  %v1939_v21 = vld [vmem:[%s2817_s3] ss:$8 sps:$4 sm:$0xff] (!%p243_p9)   ;;  %v1894_v22 = vld [vmem:[%s2815_s1 + $0x90] ss:$8 sps:$4 sm:$0xff] (!%p243_p9)  }
  0x15   : > { %s2829_s23 = smov (!%p276_p10, %s1668_s23), 31  ;;  %980 = vmatprep.subr.bf16.mxu1 %v1937_v20  ;;  %v1940_v23 = vld [vmem:[%s2817_s3 + $0x14] ss:$8 sps:$4 sm:$0xff]   ;;  %v1895_v24 = vld [vmem:[%s2815_s1 + $0xa4] ss:$8 sps:$4 sm:$0xff]   ;;  %s1667_s15 = sshll.u32 %s272_s13, 8 }
  0x16   : > { %s1789_s22 = sshll.u32 %s2829_s23, 3  ;;  %981 = vmatpush1.bf16.msra.mxu1 %v1939_v21  ;;  %v1942_v25 = vld [vmem:[%s2817_s3 + $0x10] ss:$8 sps:$4 sm:$0xff]   ;;  %v1943_v26 = vld [vmem:[%s2817_s3 + $0x24] ss:$8 sps:$4 sm:$0xff]   ;;  %s2700_s16 = scalar_lea.vmem [#allocation2], %s1667_s15 }
  0x17   : > { %588 = vmatpush1.bf16.msra.mxu0 %v1873_v5  ;;  %s2228_s14 = scalar_lea.vmem %s2814_s0, %s1789_s22  ;;  %982 = vmatprep.subr.bf16.mxu1 %v1940_v23  ;;  %v1897_v27 = vld [vmem:[%s2815_s1 + $0xa0] ss:$8 sps:$4 sm:$0xff]   ;;  %v1898_v28 = vld [vmem:[%s2815_s1 + $0xb4] ss:$8 sps:$4 sm:$0xff]   ;;  %v1900_v31 = vld [vmem:[%s2815_s1 + $0xb0] ss:$8 sps:$4 sm:$0xff]  }
  0x18   : > { %589 = vmatprep.subr.bf16.mxu0 %v1874_v6  ;;  %v1915_v13 = vld [vmem:[%s2228_s14 + $0x4] ss:$8 sps:$4 sm:$0xff]   ;;  %v1945_v29 = vld [vmem:[%s2817_s3 + $0x20] ss:$8 sps:$4 sm:$0xff]   ;;  %v1946_v30 = vld [vmem:[%s2817_s3 + $0x34] ss:$8 sps:$4 sm:$0xff]  }
  0x19   : > { %615 = vmatprep.mubr.bf16.mxu0 %v1915_v13  ;;  %v1901_v32 = vld [vmem:[%s2815_s1 + $0xc4] ss:$8 sps:$4 sm:$0xff]   ;;  %v1948_v33 = vld [vmem:[%s2817_s3 + $0x30] ss:$8 sps:$4 sm:$0xff]   ;;  %v1903_v35 = vld [vmem:[%s2815_s1 + $0xc0] ss:$8 sps:$4 sm:$0xff]  }
  0x1a   : > { %983 = vmatpush1.bf16.msra.mxu1 %v1942_v25  ;;  %v1949_v34 = vld [vmem:[%s2817_s3 + $0x44] ss:$8 sps:$4 sm:$0xff]   ;;  %v1904_v36 = vld [vmem:[%s2815_s1 + $0xd4] ss:$8 sps:$4 sm:$0xff]   ;;  %v1951_v37 = vld [vmem:[%s2817_s3 + $0x40] ss:$8 sps:$4 sm:$0xff]  }
  0x1b   : > { %590 = vmatpush1.bf16.msra.mxu0 %v1876_v7  ;;  %984 = vmatprep.subr.bf16.mxu1 %v1943_v26  ;;  %v1952_v38 = vld [vmem:[%s2817_s3 + $0x54] ss:$8 sps:$4 sm:$0xff]   ;;  %v1906_v39 = vld [vmem:[%s2815_s1 + $0xd0] ss:$8 sps:$4 sm:$0xff]   ;;  %v1907_v41 = vld [vmem:[%s2815_s1 + $0xe4] ss:$8 sps:$4 sm:$0xff]  }
  0x1c   : > { %591 = vmatprep.subr.bf16.mxu0 %v1877_v8  ;;  %v1954_v40 = vld [vmem:[%s2817_s3 + $0x50] ss:$8 sps:$4 sm:$0xff]   ;;  %v1955_v42 = vld [vmem:[%s2817_s3 + $0x64] ss:$8 sps:$4 sm:$0xff]   ;;  %v1909_v43 = vld [vmem:[%s2815_s1 + $0xe0] ss:$8 sps:$4 sm:$0xff]  }
  0x1d   : > { %v1957_v44 = vld [vmem:[%s2817_s3 + $0x60] ss:$8 sps:$4 sm:$0xff]   ;;  %v1910_v45 = vld [vmem:[%s2815_s1 + $0xf4] ss:$8 sps:$4 sm:$0xff]   ;;  %v1912_v47 = vld [vmem:[%s2815_s1 + $0xf0] ss:$8 sps:$4 sm:$0xff]  }
  0x1e   : > { %985 = vmatpush1.bf16.msra.mxu1 %v1945_v29  ;;  %v1958_v46 = vld [vmem:[%s2817_s3 + $0x74] ss:$8 sps:$4 sm:$0xff]   ;;  %v1960_v48 = vld [vmem:[%s2817_s3 + $0x70] ss:$8 sps:$4 sm:$0xff]   ;;  %v1961_v49 = vld [vmem:[%s2817_s3 + $0x84] ss:$8 sps:$4 sm:$0xff]  }
  0x1f   : > { %592 = vmatpush1.bf16.msra.mxu0 %v1879_v9  ;;  %986 = vmatprep.subr.bf16.mxu1 %v1946_v30  ;;  %v1913_v50 = vld [vmem:[%s2228_s14] ss:$8 sps:$4 sm:$0xff]   ;;  %v1916_v51 = vld [vmem:[%s2228_s14 + $0x14] ss:$8 sps:$4 sm:$0xff]   ;;  %v1966_v54 = vld [vmem:[%s2817_s3 + $0x90] ss:$8 sps:$4 sm:$0xff]  }
  0x20   : > { %593 = vmatprep.subr.bf16.mxu0 %v1880_v10  ;;  %v1963_v52 = vld [vmem:[%s2817_s3 + $0x80] ss:$8 sps:$4 sm:$0xff]   ;;  %v1964_v53 = vld [vmem:[%s2817_s3 + $0x94] ss:$8 sps:$4 sm:$0xff]   ;;  %v1967_v55 = vld [vmem:[%s2817_s3 + $0xa4] ss:$8 sps:$4 sm:$0xff]  }
  0x21   : > { %v1918_v56 = vld [vmem:[%s2228_s14 + $0x10] ss:$8 sps:$4 sm:$0xff]   ;;  %v1919_v57 = vld [vmem:[%s2228_s14 + $0x24] ss:$8 sps:$4 sm:$0xff]   ;;  %v1969_v58 = vld [vmem:[%s2817_s3 + $0xa0] ss:$8 sps:$4 sm:$0xff]  }
  0x22   : > { %987 = vmatpush1.bf16.msra.mxu1 %v1948_v33  ;;  %v1970_v59 = vld [vmem:[%s2817_s3 + $0xb4] ss:$8 sps:$4 sm:$0xff]   ;;  %v1972_v60 = vld [vmem:[%s2817_s3 + $0xb0] ss:$8 sps:$4 sm:$0xff]   ;;  %v1973_v61 = vld [vmem:[%s2817_s3 + $0xc4] ss:$8 sps:$4 sm:$0xff]  }
  0x23   : > { %594 = vmatpush1.bf16.msra.mxu0 %v1882_v11  ;;  %988 = vmatprep.subr.bf16.mxu1 %v1949_v34  ;;  %v1921_v62 = vld [vmem:[%s2228_s14 + $0x20] ss:$8 sps:$4 sm:$0xff]   ;;  %v1922_v63 = vld [vmem:[%s2228_s14 + $0x34] ss:$8 sps:$4 sm:$0xff]   ;;  %v1924_v1 = vld [vmem:[%s2228_s14 + $0x30] ss:$8 sps:$4 sm:$0xff]  }
  0x24   : > { %595 = vmatprep.subr.bf16.mxu0 %v1883_v12  ;;  %v1975_v0 = vld [vmem:[%s2817_s3 + $0xc0] ss:$8 sps:$4 sm:$0xff]   ;;  %v1925_v2 = vld [vmem:[%s2228_s14 + $0x44] ss:$8 sps:$4 sm:$0xff]   ;;  %v1928_v4 = vld [vmem:[%s2228_s14 + $0x54] ss:$8 sps:$4 sm:$0xff]  }
  0x25   : > { %v1927_v3 = vld [vmem:[%s2228_s14 + $0x40] ss:$8 sps:$4 sm:$0xff]   ;;  %v1930_v5 = vld [vmem:[%s2228_s14 + $0x50] ss:$8 sps:$4 sm:$0xff]   ;;  %v1931_v6 = vld [vmem:[%s2228_s14 + $0x64] ss:$8 sps:$4 sm:$0xff]  }
  0x26   : > { %989 = vmatpush1.bf16.msra.mxu1 %v1951_v37  ;;  %v1933_v7 = vld [vmem:[%s2228_s14 + $0x60] ss:$8 sps:$4 sm:$0xff]   ;;  %v1934_v8 = vld [vmem:[%s2228_s14 + $0x74] ss:$8 sps:$4 sm:$0xff]   ;;  %v1936_v9 = vld [vmem:[%s2228_s14 + $0x70] ss:$8 sps:$4 sm:$0xff]  }
  0x27   : > { %596 = vmatpush1.bf16.msra.mxu0 %v1885_v14  ;;  %990 = vmatprep.subr.bf16.mxu1 %v1952_v38  ;;  %v1976_v10 = vld [vmem:[%s2817_s3 + $0xd4] ss:$8 sps:$4 sm:$0xff]   ;;  %v1978_v11 = vld [vmem:[%s2817_s3 + $0xd0] ss:$8 sps:$4 sm:$0xff]   ;;  %v1979_v12 = vld [vmem:[%s2817_s3 + $0xe4] ss:$8 sps:$4 sm:$0xff]  }
  0x28   : > { %597 = vmatprep.subr.bf16.mxu0 %v1886_v15  ;;  %v1981_v13 = vld [vmem:[%s2817_s3 + $0xe0] ss:$8 sps:$4 sm:$0xff]   ;;  %v1982_v14 = vld [vmem:[%s2817_s3 + $0xf4] ss:$8 sps:$4 sm:$0xff]   ;;  %v1984_v15 = vld [vmem:[%s2817_s3 + $0xf0] ss:$8 sps:$4 sm:$0xff]  }
  0x29   : > { %v2425_v20 = vld [vmem:[%s2819_s5 + $0x24] ss:$8 sps:$4 sm:$0xff]   ;;  %v2431_v21 = vld [vmem:[%s2819_s5 + $0x20] ss:$8 sps:$4 sm:$0xff]   ;;  %v2443_v23 = vld [vmem:[%s2819_s5 + $0x30] ss:$8 sps:$4 sm:$0xff]  }
  0x2a   : > { %991 = vmatpush1.bf16.msra.mxu1 %v1954_v40  ;;  %v2455_v25 = vld [vmem:[%s2819_s5 + $0x40] ss:$8 sps:$4 sm:$0xff]   ;;  %v2461_v26 = vld [vmem:[%s2819_s5 + $0x54] ss:$8 sps:$4 sm:$0xff]   ;;  %v333_v40 = vlaneseq  ;;  %s1791_s17 = sshll.u32 %s2161_s28, 12  ;;  %s1601_s23 = sshll.u32 %s2700_s16, 4  ;;  %s2766_s23 = int_to_ptr.vmem [resolvable:$true] %s1601_s23 }
  0x2b   : > { %598 = vmatpush1.bf16.msra.mxu0 %v1888_v16  ;;  %992 = vmatprep.subr.bf16.mxu1 %v1955_v42  ;;  %v2405_v16 = vld [vmem:[%s2819_s5] ss:$8 sps:$4 sm:$0xff]   ;;  %v2485_v30 = vld [vmem:[%s2819_s5 + $0x74] ss:$8 sps:$4 sm:$0xff]   ;;  %s2764_s20 = scalar_lea.hbm %s2821_s7, %s1791_s17  ;;  %s2773_s28 = scalar_lea.sflag [#allocation3], %s272_s13 }
  0x2c   : > { %599 = vmatprep.subr.bf16.mxu0 %v1889_v17  ;;  %v1987_v17 = vld [vmem:[%s2819_s5 + $0x4] ss:$8 sps:$4 sm:$0xff]   ;;  %v2479_v29 = vld [vmem:[%s2819_s5 + $0x60] ss:$8 sps:$4 sm:$0xff]   ;;  %v2509_v34 = vld [vmem:[%s2819_s5 + $0x94] ss:$8 sps:$4 sm:$0xff]  }
  0x2d   : > { %v2503_v33 = vld [vmem:[%s2819_s5 + $0x80] ss:$8 sps:$4 sm:$0xff]   ;;  %v2533_v38 = vld [vmem:[%s2819_s5 + $0xb4] ss:$8 sps:$4 sm:$0xff]   ;;  %s2033_s21 = scalar_lea.vmem %s2766_s23, 4096  ;;  %s2097_s22 = smov [#allocation2]  }
  0x2e   : > { %993 = vmatpush1.bf16.msra.mxu1 %v1957_v44  ;;  %v2527_v37 = vld [vmem:[%s2819_s5 + $0xa0] ss:$8 sps:$4 sm:$0xff]   ;;  %p2034_p11 = scmp.ne.s32.totalorder %s2766_s23, %s2033_s21  ;;  %s2037_s14 = sshll.u32 %s2097_s22, 4  ;;  %s2038_s14 = int_to_ptr.vmem [resolvable:$false] %s2037_s14 }
  0x2f   : > { %600 = vmatpush1.bf16.msra.mxu0 %v1891_v18  ;;  %994 = vmatprep.subr.bf16.mxu1 %v1958_v46  ;;  %v2413_v18 = vld [vmem:[%s2819_s5 + $0x14] ss:$8 sps:$4 sm:$0xff]   ;;  %v2551_v42 = vld [vmem:[%s2819_s5 + $0xc0] ss:$8 sps:$4 sm:$0xff]   ;;  %s2039_s29 = scalar_lea.vmem %s2038_s14, 8192  ;;  %p2040_p0 = scmp.lt.s32.totalorder %s2766_s23, %s2038_s14 }
  0x30   : > { %601 = vmatprep.subr.bf16.mxu0 %v1892_v19  ;;  %v2419_v19 = vld [vmem:[%s2819_s5 + $0x10] ss:$8 sps:$4 sm:$0xff]   ;;  %p2035_p12 = pnand %p2034_p11, %p2178_p5  ;;  %p2041_p1 = scmp.lt.s32.totalorder %s2039_s29, %s2033_s21 }
  0x32   : > { %995 = vmatpush1.bf16.msra.mxu1 %v1960_v48  ;;  %p2036_p13 = pneg %p2035_p12  ;;  %p2042_p2 = por %p2041_p1, %p2040_p0 }
  0x33   : > { %602 = vmatpush1.bf16.msra.mxu0 %v1894_v22  ;;  %996 = vmatprep.subr.bf16.mxu1 %v1961_v49  ;;  %v2437_v22 = vld [vmem:[%s2819_s5 + $0x34] ss:$8 sps:$4 sm:$0xff]  }
  0x34   : > { %603 = vmatprep.subr.bf16.mxu0 %v1895_v24  ;;  %v2449_v24 = vld [vmem:[%s2819_s5 + $0x44] ss:$8 sps:$4 sm:$0xff]   ;;  %p2043_p3 = pnand %p2042_p2, %p2036_p13 }
  0x36   : > { %997 = vmatpush1.bf16.msra.mxu1 %v1963_v52 }
  0x37   : > { %604 = vmatpush1.bf16.msra.mxu0 %v1897_v27  ;;  %998 = vmatprep.subr.bf16.mxu1 %v1964_v53  ;;  %v2467_v27 = vld [vmem:[%s2819_s5 + $0x50] ss:$8 sps:$4 sm:$0xff]  }
  0x38   : > { %605 = vmatprep.subr.bf16.mxu0 %v1898_v28  ;;  %v2473_v28 = vld [vmem:[%s2819_s5 + $0x64] ss:$8 sps:$4 sm:$0xff]  }
  0x3a   : > { %999 = vmatpush1.bf16.msra.mxu1 %v1966_v54 }
  0x3b   : > { %606 = vmatpush1.bf16.msra.mxu0 %v1900_v31  ;;  %1000 = vmatprep.subr.bf16.mxu1 %v1967_v55  ;;  %v2491_v31 = vld [vmem:[%s2819_s5 + $0x70] ss:$8 sps:$4 sm:$0xff]  }
  0x3c   : > { %607 = vmatprep.subr.bf16.mxu0 %v1901_v32  ;;  %v2497_v32 = vld [vmem:[%s2819_s5 + $0x84] ss:$8 sps:$4 sm:$0xff]  }
  0x3e   : > { %1001 = vmatpush1.bf16.msra.mxu1 %v1969_v58 }
  0x3f   : > { %608 = vmatpush1.bf16.msra.mxu0 %v1903_v35  ;;  %1002 = vmatprep.subr.bf16.mxu1 %v1970_v59  ;;  %v2515_v35 = vld [vmem:[%s2819_s5 + $0x90] ss:$8 sps:$4 sm:$0xff]  }
  0x40   : > { %609 = vmatprep.subr.bf16.mxu0 %v1904_v36  ;;  %v2521_v36 = vld [vmem:[%s2819_s5 + $0xa4] ss:$8 sps:$4 sm:$0xff]  }
  0x42   : > { %1003 = vmatpush1.bf16.msra.mxu1 %v1972_v60 }
  0x43   : > { %610 = vmatpush1.bf16.msra.mxu0 %v1906_v39  ;;  %1004 = vmatprep.subr.bf16.mxu1 %v1973_v61  ;;  %v2539_v39 = vld [vmem:[%s2819_s5 + $0xb0] ss:$8 sps:$4 sm:$0xff]  }
  0x44   : > { %611 = vmatprep.subr.bf16.mxu0 %v1907_v41  ;;  %v2545_v41 = vld [vmem:[%s2819_s5 + $0xc4] ss:$8 sps:$4 sm:$0xff]  }
  0x46   : > { %1005 = vmatpush1.bf16.msra.mxu1 %v1975_v0 }
  0x47   : > { %612 = vmatpush1.bf16.msra.mxu0 %v1909_v43  ;;  %1006 = vmatprep.subr.bf16.mxu1 %v1976_v10  ;;  %v334_v43 = vshrl.u32 %v333_v40, 7 }
  0x48   : > { %613 = vmatprep.subr.bf16.mxu0 %v1910_v45  ;;  %v331_v45 = vld [vmem:[%s2816_s2] sm:$0x3] }
  0x49   : > { %v2555_v44 = vsub.s32 0, %v334_v43  ;;  %v2560_v46 = vsub.s32 1, %v334_v43 }
  0x4a   : > { %1007 = vmatpush1.bf16.msra.mxu1 %v1978_v11 }
  0x4b   : > { %614 = vmatpush1.bf16.msra.mxu0 %v1912_v47  ;;  %1008 = vmatprep.subr.bf16.mxu1 %v1979_v12  ;;  %v2563_v47 = vrot.slane %v331_v45, %v2555_v44  ;;  %v2566_v48 = vrot.slane %v331_v45, %v2560_v46 }
  0x4c   : > { %1377 = vmatprep.subr.bf16.mxu0 %v1987_v17 }
  0x4e   : > { %616 = vmatmul.mubr.bf16.vlgmr.msra.gmra.mrb[0].mxu0 %v1913_v50  ;;  %1009 = vmatpush1.bf16.msra.mxu1 %v1981_v13 }
  0x4f   : > { %625 = vmatprep.mubr.bf16.mxu0 %v1916_v51  ;;  %1010 = vmatprep.subr.bf16.mxu1 %v1982_v14 }
  0x50   : > { %1378 = vmatpush1.bf16.msra.mxu0 %v2405_v16 }
  0x51   : > { %1379 = vmatprep.subr.bf16.mxu0 %v2413_v18 }
  0x52   : > { %1011 = vmatpush1.bf16.msra.mxu1 %v1984_v15 }
  0x53   : > { %1792 = vmatprep.subr.bf16.mxu1 %v1987_v17 }
  0x54   : > { %1380 = vmatpush1.bf16.msra.mxu0 %v2419_v19 }
  0x55   : > { %1381 = vmatprep.subr.bf16.mxu0 %v2425_v20 }
  0x56   : > { %626 = vmatmul.mubr.bf16.gmra.mrb[4].mxu0 %v1918_v56 }
  0x57   : > { %635 = vmatprep.mubr.bf16.mxu0 %v1919_v57 }
  0x58   : > { %1382 = vmatpush1.bf16.msra.mxu0 %v2431_v21 }
  0x59   : > { %1383 = vmatprep.subr.bf16.mxu0 %v2437_v22 }
  0x5c   : > { %1384 = vmatpush1.bf16.msra.mxu0 %v2443_v23 }
  0x5d   : > { %1385 = vmatprep.subr.bf16.mxu0 %v2449_v24 }
  0x5e   : > { %636 = vmatmul.mubr.bf16.gmra.mrb[8].mxu0 %v1921_v62 }
  0x5f   : > { %645 = vmatprep.mubr.bf16.mxu0 %v1922_v63 }
  0x60   : > { %1386 = vmatpush1.bf16.msra.mxu0 %v2455_v25 }
  0x61   : > { %1387 = vmatprep.subr.bf16.mxu0 %v2461_v26 }
  0x64   : > { %1388 = vmatpush1.bf16.msra.mxu0 %v2467_v27 }
  0x65   : > { %1389 = vmatprep.subr.bf16.mxu0 %v2473_v28 }
  0x66   : > { %646 = vmatmul.mubr.bf16.gmra.mrb[12].mxu0 %v1924_v1 }
  0x67   : > { %655 = vmatprep.mubr.bf16.mxu0 %v1925_v2 }
  0x68   : > { %1390 = vmatpush1.bf16.msra.mxu0 %v2479_v29 }
  0x69   : > { %1391 = vmatprep.subr.bf16.mxu0 %v2485_v30 }
  0x6c   : > { %1392 = vmatpush1.bf16.msra.mxu0 %v2491_v31 }
  0x6d   : > { %1393 = vmatprep.subr.bf16.mxu0 %v2497_v32 }
  0x6e   : > { %656 = vmatmul.mubr.bf16.gmra.mrb[16].mxu0 %v1927_v3 }
  0x6f   : > { %665 = vmatprep.mubr.bf16.mxu0 %v1928_v4 }
  0x70   : > { %1394 = vmatpush1.bf16.msra.mxu0 %v2503_v33 }
  0x71   : > { %1395 = vmatprep.subr.bf16.mxu0 %v2509_v34 }
  0x74   : > { %1396 = vmatpush1.bf16.msra.mxu0 %v2515_v35 }
  0x75   : > { %1397 = vmatprep.subr.bf16.mxu0 %v2521_v36 }
  0x76   : > { %666 = vmatmul.mubr.bf16.gmra.mrb[20].mxu0 %v1930_v5 }
  0x77   : > { %675 = vmatprep.mubr.bf16.mxu0 %v1931_v6 }
  0x78   : > { %1398 = vmatpush1.bf16.msra.mxu0 %v2527_v37 }
  0x79   : > { %1399 = vmatprep.subr.bf16.mxu0 %v2533_v38 }
  0x7c   : > { %1400 = vmatpush1.bf16.msra.mxu0 %v2539_v39 }
  0x7d   : > { %1401 = vmatprep.subr.bf16.mxu0 %v2545_v41 }
  0x7e   : > { %676 = vmatmul.mubr.bf16.gmra.mrb[24].mxu0 %v1933_v7 }
  0x7f   : > { %685 = vmatprep.mubr.bf16.mxu0 %v1934_v8 }
  0x80   : > { %1402 = vmatpush1.bf16.msra.mxu0 %v2551_v42 }
  0x86   : > { %686 = vmatmul.mubr.bf16.gmra.mrb[28].mxu0 %v1936_v9 }
 0x121   : > { %v617_v49 = vpop.f32.mrb[0].mxu0 }
 0x122   : > { %v618_v50 = vadd.f32 %v617_v49, %v2563_v47  ;;  %v619_v51 = vpop.f32.mrb[1].mxu0 }
 0x123   : > { %v620_v52 = vadd.f32 %v619_v51, %v2566_v48  ;;  %v621_v53 = vpop.f32.mrb[2].mxu0 }
 0x124   : > { %v696_v54 = vmul.f32 0.01, %v618_v50  ;;  %v622_v55 = vadd.f32 %v621_v53, %v2563_v47  ;;  %v623_v56 = vpop.f32.mrb[3].mxu0 }
 0x125   : > { %v697_v57 = vmul.f32 0.01, %v620_v52  ;;  %v624_v58 = vadd.f32 %v623_v56, %v2566_v48 }
 0x126   : > { %v698_v59 = vmul.f32 0.01, %v622_v55  ;;  %v728_v61 = vmax.f32 %v618_v50, %v696_v54 }
 0x127   : > { %v699_v60 = vmul.f32 0.01, %v624_v58  ;;  %v729_v0 = vmax.f32 %v620_v52, %v697_v57 }
 0x128   : > { %v730_v62 = vmax.f32 %v622_v55, %v698_v59 }
 0x129   : > { %v627_v63 = vpop.f32.mrb[4].mxu0  ;;  %v731_v1 = vmax.f32 %v624_v58, %v699_v60 }
 0x12a   : > { %v628_v2 = vadd.f32 %v627_v63, %v2563_v47  ;;  %v629_v3 = vpop.f32.mrb[5].mxu0  ;;  %v760_v4 = vpack.c.bf16 %v730_v62, %v728_v61 }
 0x12b   : > { %v630_v5 = vadd.f32 %v629_v3, %v2566_v48  ;;  %v631_v6 = vpop.f32.mrb[6].mxu0  ;;  %v761_v7 = vpack.c.bf16 %v731_v1, %v729_v0 }
 0x12c   : > { %v700_v8 = vmul.f32 0.01, %v628_v2  ;;  %v632_v9 = vadd.f32 %v631_v6, %v2563_v47  ;;  %v633_v10 = vpop.f32.mrb[7].mxu0 }
 0x12d   : > { %v701_v11 = vmul.f32 0.01, %v630_v5  ;;  %v634_v12 = vadd.f32 %v633_v10, %v2566_v48  ;;  %1012 = vmatprep.mubr.bf16.mxu1 %v761_v7 }
 0x12e   : > { %v702_v13 = vmul.f32 0.01, %v632_v9  ;;  %1013 = vmatmul.mubr.bf16.vlgmr.msra.gmra.mrb[0].mxu1 %v760_v4  ;;  %v732_v15 = vmax.f32 %v628_v2, %v700_v8 }
 0x12f   : > { %v703_v14 = vmul.f32 0.01, %v634_v12  ;;  %1808 = vmatpush1.bf16.msra.mxu1 %v2405_v16  ;;  %v733_v40 = vmax.f32 %v630_v5, %v701_v11 }
 0x130   : > { %v734_v17 = vmax.f32 %v632_v9, %v702_v13  ;;  %1793 = vmatprep.subr.bf16.mxu1 %v2413_v18 }
 0x131   : > { %v735_v43 = vmax.f32 %v634_v12, %v703_v14  ;;  %v637_v45 = vpop.f32.mrb[8].mxu0 }
 0x132   : > { %v638_v49 = vadd.f32 %v637_v45, %v2563_v47  ;;  %v639_v50 = vpop.f32.mrb[9].mxu0  ;;  %v762_v51 = vpack.c.bf16 %v734_v17, %v732_v15 }
 0x133   : > { %v640_v52 = vadd.f32 %v639_v50, %v2566_v48  ;;  %v641_v53 = vpop.f32.mrb[10].mxu0  ;;  %v763_v54 = vpack.c.bf16 %v735_v43, %v733_v40  ;;  %1809 = vmatpush1.bf16.msra.mxu1 %v2419_v19 }
 0x134   : > { %v704_v55 = vmul.f32 0.01, %v638_v49  ;;  %v642_v16 = vadd.f32 %v641_v53, %v2563_v47  ;;  %v643_v56 = vpop.f32.mrb[11].mxu0  ;;  %1794 = vmatprep.subr.bf16.mxu1 %v2425_v20 }
 0x135   : > { %v705_v18 = vmul.f32 0.01, %v640_v52  ;;  %v644_v57 = vadd.f32 %v643_v56, %v2566_v48  ;;  %1022 = vmatprep.mubr.bf16.mxu1 %v763_v54 }
 0x136   : > { %v706_v58 = vmul.f32 0.01, %v642_v16  ;;  %1023 = vmatmul.mubr.bf16.gmra.mrb[4].mxu1 %v762_v51  ;;  %v736_v60 = vmax.f32 %v638_v49, %v704_v55 }
 0x137   : > { %v707_v59 = vmul.f32 0.01, %v644_v57  ;;  %1810 = vmatpush1.bf16.msra.mxu1 %v2431_v21  ;;  %v737_v19 = vmax.f32 %v640_v52, %v705_v18 }
 0x138   : > { %v738_v61 = vmax.f32 %v642_v16, %v706_v58  ;;  %1795 = vmatprep.subr.bf16.mxu1 %v2437_v22 }
 0x139   : > { %v739_v62 = vmax.f32 %v644_v57, %v707_v59  ;;  %v647_v63 = vpop.f32.mrb[12].mxu0 }
 0x13a   : > { %v648_v0 = vadd.f32 %v647_v63, %v2563_v47  ;;  %v649_v1 = vpop.f32.mrb[13].mxu0  ;;  %v764_v20 = vpack.c.bf16 %v738_v61, %v736_v60 }
 0x13b   : > { %v650_v2 = vadd.f32 %v649_v1, %v2566_v48  ;;  %v651_v3 = vpop.f32.mrb[14].mxu0  ;;  %v765_v4 = vpack.c.bf16 %v739_v62, %v737_v19  ;;  %1811 = vmatpush1.bf16.msra.mxu1 %v2443_v23 }
 0x13c   : > { %v708_v5 = vmul.f32 0.01, %v648_v0  ;;  %v652_v21 = vadd.f32 %v651_v3, %v2563_v47  ;;  %v653_v6 = vpop.f32.mrb[15].mxu0  ;;  %1796 = vmatprep.subr.bf16.mxu1 %v2449_v24 }
 0x13d   : > { %v709_v22 = vmul.f32 0.01, %v650_v2  ;;  %v654_v7 = vadd.f32 %v653_v6, %v2566_v48  ;;  %1032 = vmatprep.mubr.bf16.mxu1 %v765_v4 }
 0x13e   : > { %v710_v8 = vmul.f32 0.01, %v652_v21  ;;  %1033 = vmatmul.mubr.bf16.gmra.mrb[8].mxu1 %v764_v20  ;;  %v740_v10 = vmax.f32 %v648_v0, %v708_v5 }
 0x13f   : > { %v711_v9 = vmul.f32 0.01, %v654_v7  ;;  %1812 = vmatpush1.bf16.msra.mxu1 %v2455_v25  ;;  %v741_v23 = vmax.f32 %v650_v2, %v709_v22 }
 0x140   : > { %v742_v11 = vmax.f32 %v652_v21, %v710_v8  ;;  %1797 = vmatprep.subr.bf16.mxu1 %v2461_v26 }
 0x141   : > { %v743_v12 = vmax.f32 %v654_v7, %v711_v9  ;;  %v657_v13 = vpop.f32.mrb[16].mxu0 }
 0x142   : > { %v658_v14 = vadd.f32 %v657_v13, %v2563_v47  ;;  %v659_v15 = vpop.f32.mrb[17].mxu0  ;;  %v766_v24 = vpack.c.bf16 %v742_v11, %v740_v10 }
 0x143   : > { %v660_v17 = vadd.f32 %v659_v15, %v2566_v48  ;;  %v661_v40 = vpop.f32.mrb[18].mxu0  ;;  %v767_v43 = vpack.c.bf16 %v743_v12, %v741_v23  ;;  %1813 = vmatpush1.bf16.msra.mxu1 %v2467_v27 }
 0x144   : > { %v712_v45 = vmul.f32 0.01, %v658_v14  ;;  %v662_v25 = vadd.f32 %v661_v40, %v2563_v47  ;;  %v663_v49 = vpop.f32.mrb[19].mxu0  ;;  %1798 = vmatprep.subr.bf16.mxu1 %v2473_v28 }
 0x145   : > { %v713_v26 = vmul.f32 0.01, %v660_v17  ;;  %v664_v50 = vadd.f32 %v663_v49, %v2566_v48  ;;  %1042 = vmatprep.mubr.bf16.mxu1 %v767_v43 }
 0x146   : > { %v714_v51 = vmul.f32 0.01, %v662_v25  ;;  %1043 = vmatmul.mubr.bf16.gmra.mrb[12].mxu1 %v766_v24  ;;  %v744_v53 = vmax.f32 %v658_v14, %v712_v45 }
 0x147   : > { %v715_v52 = vmul.f32 0.01, %v664_v50  ;;  %1814 = vmatpush1.bf16.msra.mxu1 %v2479_v29  ;;  %v745_v27 = vmax.f32 %v660_v17, %v713_v26 }
 0x148   : > { %v746_v54 = vmax.f32 %v662_v25, %v714_v51  ;;  %1799 = vmatprep.subr.bf16.mxu1 %v2485_v30 }
 0x149   : > { %v747_v55 = vmax.f32 %v664_v50, %v715_v52  ;;  %v667_v16 = vpop.f32.mrb[20].mxu0 }
 0x14a   : > { %v668_v56 = vadd.f32 %v667_v16, %v2563_v47  ;;  %v669_v18 = vpop.f32.mrb[21].mxu0  ;;  %v768_v28 = vpack.c.bf16 %v746_v54, %v744_v53  ;;  %v808_v16 = vld [vmem:[%s2818_s4] sm:$0x3] }
 0x14b   : > { %v670_v57 = vadd.f32 %v669_v18, %v2566_v48  ;;  %v671_v58 = vpop.f32.mrb[22].mxu0  ;;  %v769_v59 = vpack.c.bf16 %v747_v55, %v745_v27  ;;  %1815 = vmatpush1.bf16.msra.mxu1 %v2491_v31  ;;  %v2032_v27 = vld [vmem:[%s2819_s5 + $0xf4] ss:$8 sps:$4 sm:$0xff]   ;;  %v2030_v55 = vld [vmem:[%s2819_s5 + $0xf0] ss:$8 sps:$4 sm:$0xff]   ;;  %v2650_v18 = vrot.slane %v808_v16, %v2560_v46 }
 0x14c   : > { %v716_v60 = vmul.f32 0.01, %v668_v56  ;;  %v672_v29 = vadd.f32 %v671_v58, %v2563_v47  ;;  %v673_v61 = vpop.f32.mrb[23].mxu0  ;;  %1800 = vmatprep.subr.bf16.mxu1 %v2497_v32 }
 0x14d   : > { %v717_v30 = vmul.f32 0.01, %v670_v57  ;;  %v674_v19 = vadd.f32 %v673_v61, %v2566_v48  ;;  %1052 = vmatprep.mubr.bf16.mxu1 %v769_v59 }
 0x14e   : > { %v718_v62 = vmul.f32 0.01, %v672_v29  ;;  %1053 = vmatmul.mubr.bf16.gmra.mrb[16].mxu1 %v768_v28  ;;  %v748_v0 = vmax.f32 %v668_v56, %v716_v60  ;;  %v2647_v56 = vrot.slane %v808_v16, %v2555_v44 }
 0x14f   : > { %v719_v63 = vmul.f32 0.01, %v674_v19  ;;  %1816 = vmatpush1.bf16.msra.mxu1 %v2503_v33  ;;  %v749_v31 = vmax.f32 %v670_v57, %v717_v30 }
 0x150   : > { %v750_v1 = vmax.f32 %v672_v29, %v718_v62  ;;  %1801 = vmatprep.subr.bf16.mxu1 %v2509_v34 }
 0x151   : > { %v751_v20 = vmax.f32 %v674_v19, %v719_v63  ;;  %v677_v2 = vpop.f32.mrb[24].mxu0 }
 0x152   : > { %v678_v3 = vadd.f32 %v677_v2, %v2563_v47  ;;  %v679_v4 = vpop.f32.mrb[25].mxu0  ;;  %v770_v32 = vpack.c.bf16 %v750_v1, %v748_v0 }
 0x153   : > { %v680_v5 = vadd.f32 %v679_v4, %v2566_v48  ;;  %v681_v21 = vpop.f32.mrb[26].mxu0  ;;  %v771_v6 = vpack.c.bf16 %v751_v20, %v749_v31  ;;  %1817 = vmatpush1.bf16.msra.mxu1 %v2515_v35 }
 0x154   : > { %v720_v22 = vmul.f32 0.01, %v678_v3  ;;  %v682_v33 = vadd.f32 %v681_v21, %v2563_v47  ;;  %v683_v7 = vpop.f32.mrb[27].mxu0  ;;  %1802 = vmatprep.subr.bf16.mxu1 %v2521_v36 }
 0x155   : > { %v721_v34 = vmul.f32 0.01, %v680_v5  ;;  %v684_v8 = vadd.f32 %v683_v7, %v2566_v48  ;;  %1062 = vmatprep.mubr.bf16.mxu1 %v771_v6 }
 0x156   : > { %v722_v9 = vmul.f32 0.01, %v682_v33  ;;  %1063 = vmatmul.mubr.bf16.gmra.mrb[20].mxu1 %v770_v32  ;;  %v752_v11 = vmax.f32 %v678_v3, %v720_v22 }
 0x157   : > { %v723_v10 = vmul.f32 0.01, %v684_v8  ;;  %1818 = vmatpush1.bf16.msra.mxu1 %v2527_v37  ;;  %v753_v35 = vmax.f32 %v680_v5, %v721_v34 }
 0x158   : > { %v754_v23 = vmax.f32 %v682_v33, %v722_v9  ;;  %1803 = vmatprep.subr.bf16.mxu1 %v2533_v38 }
 0x159   : > { %v755_v12 = vmax.f32 %v684_v8, %v723_v10  ;;  %v687_v13 = vpop.f32.mrb[28].mxu0 }
 0x15a   : > { %v688_v14 = vadd.f32 %v687_v13, %v2563_v47  ;;  %v689_v15 = vpop.f32.mrb[29].mxu0  ;;  %v772_v36 = vpack.c.bf16 %v754_v23, %v752_v11 }
 0x15b   : > { %v690_v24 = vadd.f32 %v689_v15, %v2566_v48  ;;  %v691_v17 = vpop.f32.mrb[30].mxu0  ;;  %v773_v40 = vpack.c.bf16 %v755_v12, %v753_v35  ;;  %1819 = vmatpush1.bf16.msra.mxu1 %v2539_v39 }
 0x15c   : > { %v724_v43 = vmul.f32 0.01, %v688_v14  ;;  %v692_v37 = vadd.f32 %v691_v17, %v2563_v47  ;;  %v693_v45 = vpop.f32.mrb[31].mxu0  ;;  %1804 = vmatprep.subr.bf16.mxu1 %v2545_v41  ;;  %v2026_v41 = vld [vmem:[%s2819_s5 + $0xd4] ss:$8 sps:$4 sm:$0xff]  }
 0x15d   : > { %v725_v38 = vmul.f32 0.01, %v690_v24  ;;  %v694_v25 = vadd.f32 %v693_v45, %v2566_v48  ;;  %1072 = vmatprep.mubr.bf16.mxu1 %v773_v40  ;;  %v2024_v47 = vld [vmem:[%s2819_s5 + $0xd0] ss:$8 sps:$4 sm:$0xff]   ;;  %1403 = vmatprep.subr.bf16.mxu0 %v2026_v41  ;;  %v2027_v48 = vld [vmem:[%s2819_s5 + $0xe0] ss:$8 sps:$4 sm:$0xff]  }
 0x15e   : > { %v726_v49 = vmul.f32 0.01, %v692_v37  ;;  %1073 = vmatmul.mubr.bf16.gmra.mrb[24].mxu1 %v772_v36  ;;  %v756_v50 = vmax.f32 %v688_v14, %v724_v43  ;;  %1404 = vmatpush1.bf16.msra.mxu0 %v2024_v47 }
 0x15f   : > { %v727_v26 = vmul.f32 0.01, %v694_v25  ;;  %1820 = vmatpush1.bf16.msra.mxu1 %v2551_v42  ;;  %v757_v52 = vmax.f32 %v690_v24, %v725_v38  ;;  %v2029_v42 = vld [vmem:[%s2819_s5 + $0xe4] ss:$8 sps:$4 sm:$0xff]  }
 0x160   : > { %v758_v51 = vmax.f32 %v692_v37, %v726_v49  ;;  %1805 = vmatprep.subr.bf16.mxu1 %v2026_v41  ;;  %1405 = vmatprep.subr.bf16.mxu0 %v2029_v42 }
 0x161   : > { %v759_v53 = vmax.f32 %v694_v25, %v727_v26 }
 0x162   : > { %v774_v39 = vpack.c.bf16 %v758_v51, %v756_v50  ;;  %1406 = vmatpush1.bf16.msra.mxu0 %v2027_v48 }
 0x163   : > { %v775_v54 = vpack.c.bf16 %v759_v53, %v757_v52  ;;  %1821 = vmatpush1.bf16.msra.mxu1 %v2024_v47  ;;  %1407 = vmatprep.subr.bf16.mxu0 %v2032_v27 }
 0x164   : > { %1806 = vmatprep.subr.bf16.mxu1 %v2029_v42 }
 0x165   : > { %1082 = vmatprep.mubr.bf16.mxu1 %v775_v54 }
 0x166   : > { %1083 = vmatmul.mubr.bf16.gmra.mrb[28].mxu1 %v774_v39  ;;  %1408 = vmatpush1.bf16.msra.mxu0 %v2030_v55 }
 0x167   : > { %1822 = vmatpush1.bf16.msra.mxu1 %v2027_v48 }
 0x168   : > { %1807 = vmatprep.subr.bf16.mxu1 %v2032_v27 }
 0x16b   : > { %1823 = vmatpush1.bf16.msra.mxu1 %v2030_v55 }
 0x201   : > { %v1014_v28 = vpop.f32.mrb[0].mxu1 }
 0x202   : > { %v1015_v57 = vadd.f32 %v1014_v28, %v2647_v56  ;;  %v1016_v58 = vpop.f32.mrb[1].mxu1 }
 0x203   : > { %v1017_v59 = vadd.f32 %v1016_v58, %v2650_v18  ;;  %v1018_v60 = vpop.f32.mrb[2].mxu1 }
 0x204   : > { %v1093_v29 = vmul.f32 0.01, %v1015_v57  ;;  %v1019_v61 = vadd.f32 %v1018_v60, %v2647_v56  ;;  %v1020_v30 = vpop.f32.mrb[3].mxu1 }
 0x205   : > { %v1094_v19 = vmul.f32 0.01, %v1017_v59  ;;  %v1021_v62 = vadd.f32 %v1020_v30, %v2650_v18 }
 0x206   : > { %v1095_v63 = vmul.f32 0.01, %v1019_v61  ;;  %v1125_v1 = vmax.f32 %v1015_v57, %v1093_v29 }
 0x207   : > { %v1096_v0 = vmul.f32 0.01, %v1021_v62  ;;  %v1126_v20 = vmax.f32 %v1017_v59, %v1094_v19 }
 0x208   : > { %v1127_v31 = vmax.f32 %v1019_v61, %v1095_v63 }
 0x209   : > { %v1128_v2 = vmax.f32 %v1021_v62, %v1096_v0  ;;  %v1024_v3 = vpop.f32.mrb[4].mxu1 }
 0x20a   : > { %v1157_v4 = vpack.c.bf16 %v1127_v31, %v1125_v1  ;;  %v1025_v32 = vadd.f32 %v1024_v3, %v2647_v56  ;;  %v1026_v5 = vpop.f32.mrb[5].mxu1 }
 0x20b   : > { %v1027_v21 = vadd.f32 %v1026_v5, %v2650_v18  ;;  %v1028_v6 = vpop.f32.mrb[6].mxu1  ;;  %v1158_v22 = vpack.c.bf16 %v1128_v2, %v1126_v20 }
 0x20c   : > { %v1097_v33 = vmul.f32 0.01, %v1025_v32  ;;  %v1029_v7 = vadd.f32 %v1028_v6, %v2647_v56  ;;  %v1030_v34 = vpop.f32.mrb[7].mxu1 }
 0x20d   : > { %v1098_v8 = vmul.f32 0.01, %v1027_v21  ;;  %v1031_v9 = vadd.f32 %v1030_v34, %v2650_v18  ;;  %1409 = vmatprep.mubr.bf16.mxu0 %v1158_v22 }
 0x20e   : > { %v1099_v10 = vmul.f32 0.01, %v1029_v7  ;;  %1410 = vmatmul.mubr.bf16.vlgmr.msra.gmra.mrb[32].mxu0 %v1157_v4  ;;  %v1129_v23 = vmax.f32 %v1025_v32, %v1097_v33 }
 0x20f   : > { %v1100_v11 = vmul.f32 0.01, %v1031_v9  ;;  %v1130_v12 = vmax.f32 %v1027_v21, %v1098_v8 }
 0x210   : > { %v1131_v35 = vmax.f32 %v1029_v7, %v1099_v10 }
 0x211   : > { %v1132_v13 = vmax.f32 %v1031_v9, %v1100_v11  ;;  %v1034_v14 = vpop.f32.mrb[8].mxu1 }
 0x212   : > { %v1035_v15 = vadd.f32 %v1034_v14, %v2647_v56  ;;  %v1036_v36 = vpop.f32.mrb[9].mxu1  ;;  %v1159_v24 = vpack.c.bf16 %v1131_v35, %v1129_v23 }
 0x213   : > { %v1037_v17 = vadd.f32 %v1036_v36, %v2650_v18  ;;  %v1038_v40 = vpop.f32.mrb[10].mxu1  ;;  %v1160_v43 = vpack.c.bf16 %v1132_v13, %v1130_v12 }
 0x214   : > { %v1101_v37 = vmul.f32 0.01, %v1035_v15  ;;  %v1039_v45 = vadd.f32 %v1038_v40, %v2647_v56  ;;  %v1040_v38 = vpop.f32.mrb[11].mxu1 }
 0x215   : > { %v1102_v25 = vmul.f32 0.01, %v1037_v17  ;;  %v1041_v49 = vadd.f32 %v1040_v38, %v2650_v18  ;;  %1419 = vmatprep.mubr.bf16.mxu0 %v1160_v43 }
 0x216   : > { %v1103_v26 = vmul.f32 0.01, %v1039_v45  ;;  %1420 = vmatmul.mubr.bf16.gmra.mrb[36].mxu0 %v1159_v24  ;;  %v1133_v51 = vmax.f32 %v1035_v15, %v1101_v37 }
 0x217   : > { %v1104_v50 = vmul.f32 0.01, %v1041_v49  ;;  %v1134_v53 = vmax.f32 %v1037_v17, %v1102_v25 }
 0x218   : > { %v1135_v52 = vmax.f32 %v1039_v45, %v1103_v26 }
 0x219   : > { %v1136_v39 = vmax.f32 %v1041_v49, %v1104_v50  ;;  %v1044_v54 = vpop.f32.mrb[12].mxu1 }
 0x21a   : > { %v1045_v41 = vadd.f32 %v1044_v54, %v2647_v56  ;;  %v1046_v47 = vpop.f32.mrb[13].mxu1  ;;  %v1161_v42 = vpack.c.bf16 %v1135_v52, %v1133_v51 }
 0x21b   : > { %v1047_v48 = vadd.f32 %v1046_v47, %v2650_v18  ;;  %v1048_v27 = vpop.f32.mrb[14].mxu1  ;;  %v1162_v55 = vpack.c.bf16 %v1136_v39, %v1134_v53 }
 0x21c   : > { %v1105_v16 = vmul.f32 0.01, %v1045_v41  ;;  %v1049_v28 = vadd.f32 %v1048_v27, %v2647_v56  ;;  %v1050_v57 = vpop.f32.mrb[15].mxu1 }
 0x21d   : > { %v1106_v58 = vmul.f32 0.01, %v1047_v48  ;;  %v1051_v59 = vadd.f32 %v1050_v57, %v2650_v18  ;;  %1429 = vmatprep.mubr.bf16.mxu0 %v1162_v55 }
 0x21e   : > { %v1107_v60 = vmul.f32 0.01, %v1049_v28  ;;  %1430 = vmatmul.mubr.bf16.gmra.mrb[40].mxu0 %v1161_v42  ;;  %v1137_v61 = vmax.f32 %v1045_v41, %v1105_v16 }
 0x21f   : > { %v1108_v29 = vmul.f32 0.01, %v1051_v59  ;;  %v1138_v19 = vmax.f32 %v1047_v48, %v1106_v58 }
 0x220   : > { %v1139_v30 = vmax.f32 %v1049_v28, %v1107_v60 }
 0x221   : > { %v1140_v62 = vmax.f32 %v1051_v59, %v1108_v29  ;;  %v1054_v63 = vpop.f32.mrb[16].mxu1 }
 0x222   : > { %v1055_v0 = vadd.f32 %v1054_v63, %v2647_v56  ;;  %v1056_v1 = vpop.f32.mrb[17].mxu1  ;;  %v1163_v31 = vpack.c.bf16 %v1139_v30, %v1137_v61 }
 0x223   : > { %v1057_v20 = vadd.f32 %v1056_v1, %v2650_v18  ;;  %v1058_v2 = vpop.f32.mrb[18].mxu1  ;;  %v1164_v3 = vpack.c.bf16 %v1140_v62, %v1138_v19 }
 0x224   : > { %v1109_v4 = vmul.f32 0.01, %v1055_v0  ;;  %v1059_v32 = vadd.f32 %v1058_v2, %v2647_v56  ;;  %v1060_v5 = vpop.f32.mrb[19].mxu1 }
 0x225   : > { %v1110_v21 = vmul.f32 0.01, %v1057_v20  ;;  %v1061_v6 = vadd.f32 %v1060_v5, %v2650_v18  ;;  %1439 = vmatprep.mubr.bf16.mxu0 %v1164_v3 }
 0x226   : > { %v1111_v22 = vmul.f32 0.01, %v1059_v32  ;;  %1440 = vmatmul.mubr.bf16.gmra.mrb[44].mxu0 %v1163_v31  ;;  %v1141_v7 = vmax.f32 %v1055_v0, %v1109_v4 }
 0x227   : > { %v1112_v33 = vmul.f32 0.01, %v1061_v6  ;;  %v1142_v8 = vmax.f32 %v1057_v20, %v1110_v21 }
 0x228   : > { %v1143_v34 = vmax.f32 %v1059_v32, %v1111_v22 }
 0x229   : > { %v1144_v9 = vmax.f32 %v1061_v6, %v1112_v33  ;;  %v1064_v10 = vpop.f32.mrb[20].mxu1 }
 0x22a   : > { %v1165_v11 = vpack.c.bf16 %v1143_v34, %v1141_v7  ;;  %v1065_v23 = vadd.f32 %v1064_v10, %v2647_v56  ;;  %v1066_v35 = vpop.f32.mrb[21].mxu1 }
 0x22b   : > { %v1067_v12 = vadd.f32 %v1066_v35, %v2650_v18  ;;  %v1068_v13 = vpop.f32.mrb[22].mxu1  ;;  %v1166_v14 = vpack.c.bf16 %v1144_v9, %v1142_v8 }
 0x22c   : > { %v1113_v15 = vmul.f32 0.01, %v1065_v23  ;;  %v1069_v36 = vadd.f32 %v1068_v13, %v2647_v56  ;;  %v1070_v24 = vpop.f32.mrb[23].mxu1 }
 0x22d   : > { %v1114_v17 = vmul.f32 0.01, %v1067_v12  ;;  %v1071_v40 = vadd.f32 %v1070_v24, %v2650_v18  ;;  %1449 = vmatprep.mubr.bf16.mxu1 %v1166_v14 }
 0x22e   : > { %v1115_v43 = vmul.f32 0.01, %v1069_v36  ;;  %1450 = vmatmul.mubr.bf16.vlgmr.msra.gmra.mrb[32].mxu1 %v1165_v11  ;;  %v1145_v45 = vmax.f32 %v1065_v23, %v1113_v15 }
 0x22f   : > { %v1116_v37 = vmul.f32 0.01, %v1071_v40  ;;  %v1146_v25 = vmax.f32 %v1067_v12, %v1114_v17 }
 0x230   : > { %v1147_v38 = vmax.f32 %v1069_v36, %v1115_v43 }
 0x231   : > { %v1148_v49 = vmax.f32 %v1071_v40, %v1116_v37  ;;  %v1074_v26 = vpop.f32.mrb[24].mxu1 }
 0x232   : > { %v1075_v50 = vadd.f32 %v1074_v26, %v2647_v56  ;;  %v1076_v51 = vpop.f32.mrb[25].mxu1  ;;  %v1167_v52 = vpack.c.bf16 %v1147_v38, %v1145_v45 }
 0x233   : > { %v1077_v53 = vadd.f32 %v1076_v51, %v2650_v18  ;;  %v1078_v39 = vpop.f32.mrb[26].mxu1  ;;  %v1168_v54 = vpack.c.bf16 %v1148_v49, %v1146_v25 }
 0x234   : > { %v1117_v41 = vmul.f32 0.01, %v1075_v50  ;;  %v1079_v47 = vadd.f32 %v1078_v39, %v2647_v56  ;;  %v1080_v42 = vpop.f32.mrb[27].mxu1 }
 0x235   : > { %v1118_v48 = vmul.f32 0.01, %v1077_v53  ;;  %v1081_v27 = vadd.f32 %v1080_v42, %v2650_v18  ;;  %1459 = vmatprep.mubr.bf16.mxu1 %v1168_v54 }
 0x236   : > { %v1119_v55 = vmul.f32 0.01, %v1079_v47  ;;  %1460 = vmatmul.mubr.bf16.gmra.mrb[36].mxu1 %v1167_v52  ;;  %v1149_v28 = vmax.f32 %v1075_v50, %v1117_v41 }
 0x237   : > { %v1120_v16 = vmul.f32 0.01, %v1081_v27  ;;  %v1150_v58 = vmax.f32 %v1077_v53, %v1118_v48 }
 0x238   : > { %v1151_v57 = vmax.f32 %v1079_v47, %v1119_v55 }
 0x239   : > { %v1152_v59 = vmax.f32 %v1081_v27, %v1120_v16  ;;  %v1084_v60 = vpop.f32.mrb[28].mxu1 }
 0x23a   : > { %v1085_v29 = vadd.f32 %v1084_v60, %v2647_v56  ;;  %v1086_v61 = vpop.f32.mrb[29].mxu1  ;;  %v1169_v30 = vpack.c.bf16 %v1151_v57, %v1149_v28 }
 0x23b   : > { %v1087_v19 = vadd.f32 %v1086_v61, %v2650_v18  ;;  %v1088_v62 = vpop.f32.mrb[30].mxu1  ;;  %v1170_v63 = vpack.c.bf16 %v1152_v59, %v1150_v58 }
 0x23c   : > { %v1121_v0 = vmul.f32 0.01, %v1085_v29  ;;  %v1089_v1 = vadd.f32 %v1088_v62, %v2647_v56  ;;  %v1090_v31 = vpop.f32.mrb[31].mxu1  ;;  %v1205_v56 = vld [vmem:[%s2820_s6] sm:$0x3] }
 0x23d   : > { %v1122_v20 = vmul.f32 0.01, %v1087_v19  ;;  %v1091_v2 = vadd.f32 %v1090_v31, %v2650_v18  ;;  %1469 = vmatprep.mubr.bf16.mxu1 %v1170_v63  ;;  %v2688_v7 = vrot.slane %v1205_v56, %v2555_v44  ;;  %v2692_v18 = vrot.slane %v1205_v56, %v2560_v46 }
 0x23e   : > { %v1123_v3 = vmul.f32 0.01, %v1089_v1  ;;  %1470 = vmatmul.mubr.bf16.gmra.mrb[40].mxu1 %v1169_v30  ;;  %v1153_v32 = vmax.f32 %v1085_v29, %v1121_v0 }
 0x23f   : > { %v1124_v4 = vmul.f32 0.01, %v1091_v2  ;;  %v1154_v21 = vmax.f32 %v1087_v19, %v1122_v20 }
 0x240   : > { %v1155_v5 = vmax.f32 %v1089_v1, %v1123_v3 }
 0x241   : > { %v1156_v6 = vmax.f32 %v1091_v2, %v1124_v4 }
 0x242   : > { %v1171_v22 = vpack.c.bf16 %v1155_v5, %v1153_v32 }
 0x243   : > { %v1172_v33 = vpack.c.bf16 %v1156_v6, %v1154_v21 }
 0x245   : > { %1479 = vmatprep.mubr.bf16.mxu1 %v1172_v33 }
 0x246   : > { %1480 = vmatmul.mubr.bf16.gmra.mrb[44].mxu1 %v1171_v22 }
 0x2e1   : > { %v1411_v34 = vpop.f32.mrb[32].mxu0 }
 0x2e2   : > { %v1412_v8 = vadd.f32 %v1411_v34, %v2688_v7  ;;  %v1413_v9 = vpop.f32.mrb[33].mxu0 }
 0x2e3   : > { %v1414_v10 = vadd.f32 %v1413_v9, %v2692_v18  ;;  %v1415_v11 = vpop.f32.mrb[34].mxu0 }
 0x2e4   : > { %v1490_v23 = vmul.f32 0.01, %v1412_v8  ;;  %v1416_v35 = vadd.f32 %v1415_v11, %v2688_v7  ;;  %v1417_v12 = vpop.f32.mrb[35].mxu0 }
 0x2e5   : > { %v1491_v13 = vmul.f32 0.01, %v1414_v10  ;;  %v1418_v44 = vadd.f32 %v1417_v12, %v2692_v18 }
 0x2e6   : > { %v1522_v14 = vmax.f32 %v1412_v8, %v1490_v23  ;;  %v1492_v15 = vmul.f32 0.01, %v1416_v35 }
 0x2e7   : > { %v1523_v46 = vmax.f32 %v1414_v10, %v1491_v13  ;;  %v1493_v36 = vmul.f32 0.01, %v1418_v44 }
 0x2e8   : > { %1554 = vst [vmem:[%s2700_s16] sm:$0xff] %v1522_v14  ;;  %v1524_v24 = vmax.f32 %v1416_v35, %v1492_v15 }
 0x2e9   : > { %1555 = vst [vmem:[%s2700_s16 + $0x8] sm:$0xff] %v1523_v46  ;;  %v1525_v17 = vmax.f32 %v1418_v44, %v1493_v36  ;;  %v1421_v40 = vpop.f32.mrb[36].mxu0 }
 0x2ea   : > { %1556 = vst [vmem:[%s2700_s16 + $0x10] sm:$0xff] %v1524_v24  ;;  %v1422_v43 = vadd.f32 %v1421_v40, %v2688_v7  ;;  %v1423_v37 = vpop.f32.mrb[37].mxu0 }
 0x2eb   : > { %1557 = vst [vmem:[%s2700_s16 + $0x18] sm:$0xff] %v1525_v17  ;;  %v1424_v45 = vadd.f32 %v1423_v37, %v2692_v18  ;;  %v1425_v38 = vpop.f32.mrb[38].mxu0 }
 0x2ec   : > { %v1494_v25 = vmul.f32 0.01, %v1422_v43  ;;  %v1426_v49 = vadd.f32 %v1425_v38, %v2688_v7  ;;  %v1427_v26 = vpop.f32.mrb[39].mxu0 }
 0x2ed   : > { %v1495_v50 = vmul.f32 0.01, %v1424_v45  ;;  %v1428_v51 = vadd.f32 %v1427_v26, %v2692_v18 }
 0x2ee   : > { %v1526_v52 = vmax.f32 %v1422_v43, %v1494_v25  ;;  %v1496_v53 = vmul.f32 0.01, %v1426_v49 }
 0x2ef   : > { %v1527_v39 = vmax.f32 %v1424_v45, %v1495_v50  ;;  %v1497_v54 = vmul.f32 0.01, %v1428_v51 }
 0x2f0   : > { %1558 = vst [vmem:[%s2700_s16 + $0x20] sm:$0xff] %v1526_v52  ;;  %v1528_v41 = vmax.f32 %v1426_v49, %v1496_v53 }
 0x2f1   : > { %1559 = vst [vmem:[%s2700_s16 + $0x28] sm:$0xff] %v1527_v39  ;;  %v1529_v47 = vmax.f32 %v1428_v51, %v1497_v54  ;;  %v1431_v42 = vpop.f32.mrb[40].mxu0 }
 0x2f2   : > { %1560 = vst [vmem:[%s2700_s16 + $0x30] sm:$0xff] %v1528_v41  ;;  %v1432_v48 = vadd.f32 %v1431_v42, %v2688_v7  ;;  %v1433_v27 = vpop.f32.mrb[41].mxu0 }
 0x2f3   : > { %1561 = vst [vmem:[%s2700_s16 + $0x38] sm:$0xff] %v1529_v47  ;;  %v1434_v55 = vadd.f32 %v1433_v27, %v2692_v18  ;;  %v1435_v16 = vpop.f32.mrb[42].mxu0 }
 0x2f4   : > { %v1498_v28 = vmul.f32 0.01, %v1432_v48  ;;  %v1436_v57 = vadd.f32 %v1435_v16, %v2688_v7  ;;  %v1437_v58 = vpop.f32.mrb[43].mxu0 }
 0x2f5   : > { %v1499_v59 = vmul.f32 0.01, %v1434_v55  ;;  %v1438_v60 = vadd.f32 %v1437_v58, %v2692_v18 }
 0x2f6   : > { %v1530_v29 = vmax.f32 %v1432_v48, %v1498_v28  ;;  %v1500_v61 = vmul.f32 0.01, %v1436_v57 }
 0x2f7   : > { %v1531_v30 = vmax.f32 %v1434_v55, %v1499_v59  ;;  %v1501_v19 = vmul.f32 0.01, %v1438_v60 }
 0x2f8   : > { %1562 = vst [vmem:[%s2700_s16 + $0x40] sm:$0xff] %v1530_v29  ;;  %v1532_v62 = vmax.f32 %v1436_v57, %v1500_v61 }
 0x2f9   : > { %1563 = vst [vmem:[%s2700_s16 + $0x48] sm:$0xff] %v1531_v30  ;;  %v1533_v63 = vmax.f32 %v1438_v60, %v1501_v19  ;;  %v1441_v0 = vpop.f32.mrb[44].mxu0 }
 0x2fa   : > { %1564 = vst [vmem:[%s2700_s16 + $0x50] sm:$0xff] %v1532_v62  ;;  %v1442_v1 = vadd.f32 %v1441_v0, %v2688_v7  ;;  %v1443_v31 = vpop.f32.mrb[45].mxu0 }
 0x2fb   : > { %1565 = vst [vmem:[%s2700_s16 + $0x58] sm:$0xff] %v1533_v63  ;;  %v1444_v20 = vadd.f32 %v1443_v31, %v2692_v18  ;;  %v1445_v2 = vpop.f32.mrb[46].mxu0 }
 0x2fc   : > { %v1502_v3 = vmul.f32 0.01, %v1442_v1  ;;  %v1446_v4 = vadd.f32 %v1445_v2, %v2688_v7  ;;  %v1447_v32 = vpop.f32.mrb[47].mxu0 }
 0x2fd   : > { %v1503_v5 = vmul.f32 0.01, %v1444_v20  ;;  %v1448_v21 = vadd.f32 %v1447_v32, %v2692_v18 }
 0x2fe   : > { %v1534_v6 = vmax.f32 %v1442_v1, %v1502_v3  ;;  %v1504_v22 = vmul.f32 0.01, %v1446_v4 }
 0x2ff   : > { %v1535_v33 = vmax.f32 %v1444_v20, %v1503_v5  ;;  %v1505_v56 = vmul.f32 0.01, %v1448_v21 }
 0x300   : > { %1566 = vst [vmem:[%s2700_s16 + $0x60] sm:$0xff] %v1534_v6  ;;  %v1536_v34 = vmax.f32 %v1446_v4, %v1504_v22 }
 0x301   : > { %1567 = vst [vmem:[%s2700_s16 + $0x68] sm:$0xff] %v1535_v33  ;;  %v1537_v8 = vmax.f32 %v1448_v21, %v1505_v56  ;;  %v1451_v9 = vpop.f32.mrb[32].mxu1 }
 0x302   : > { %1568 = vst [vmem:[%s2700_s16 + $0x70] sm:$0xff] %v1536_v34  ;;  %v1452_v10 = vadd.f32 %v1451_v9, %v2688_v7  ;;  %v1453_v11 = vpop.f32.mrb[33].mxu1 }
 0x303   : > { %1569 = vst [vmem:[%s2700_s16 + $0x78] sm:$0xff] %v1537_v8  ;;  %v1454_v23 = vadd.f32 %v1453_v11, %v2692_v18  ;;  %v1455_v35 = vpop.f32.mrb[34].mxu1 }
 0x304   : > { %v1506_v12 = vmul.f32 0.01, %v1452_v10  ;;  %v1456_v13 = vadd.f32 %v1455_v35, %v2688_v7  ;;  %v1457_v44 = vpop.f32.mrb[35].mxu1 }
 0x305   : > { %v1507_v14 = vmul.f32 0.01, %v1454_v23  ;;  %v1458_v15 = vadd.f32 %v1457_v44, %v2692_v18 }
 0x306   : > { %v1538_v46 = vmax.f32 %v1452_v10, %v1506_v12  ;;  %v1508_v36 = vmul.f32 0.01, %v1456_v13 }
 0x307   : > { %v1539_v24 = vmax.f32 %v1454_v23, %v1507_v14  ;;  %v1509_v17 = vmul.f32 0.01, %v1458_v15 }
 0x308   : > { %1570 = vst [vmem:[%s2700_s16 + $0x80] sm:$0xff] %v1538_v46  ;;  %v1540_v40 = vmax.f32 %v1456_v13, %v1508_v36 }
 0x309   : > { %1571 = vst [vmem:[%s2700_s16 + $0x88] sm:$0xff] %v1539_v24  ;;  %v1541_v43 = vmax.f32 %v1458_v15, %v1509_v17  ;;  %v1461_v37 = vpop.f32.mrb[36].mxu1 }
 0x30a   : > { %1572 = vst [vmem:[%s2700_s16 + $0x90] sm:$0xff] %v1540_v40  ;;  %v1462_v45 = vadd.f32 %v1461_v37, %v2688_v7  ;;  %v1463_v38 = vpop.f32.mrb[37].mxu1 }
 0x30b   : > { %1573 = vst [vmem:[%s2700_s16 + $0x98] sm:$0xff] %v1541_v43  ;;  %v1464_v25 = vadd.f32 %v1463_v38, %v2692_v18  ;;  %v1465_v49 = vpop.f32.mrb[38].mxu1 }
 0x30c   : > { %v1510_v26 = vmul.f32 0.01, %v1462_v45  ;;  %v1466_v50 = vadd.f32 %v1465_v49, %v2688_v7  ;;  %v1467_v51 = vpop.f32.mrb[39].mxu1 }
 0x30d   : > { %v1511_v52 = vmul.f32 0.01, %v1464_v25  ;;  %v1468_v53 = vadd.f32 %v1467_v51, %v2692_v18 }
 0x30e   : > { %v1542_v39 = vmax.f32 %v1462_v45, %v1510_v26  ;;  %v1512_v54 = vmul.f32 0.01, %v1466_v50 }
 0x30f   : > { %v1543_v41 = vmax.f32 %v1464_v25, %v1511_v52  ;;  %v1513_v47 = vmul.f32 0.01, %v1468_v53 }
 0x310   : > { %1574 = vst [vmem:[%s2700_s16 + $0xa0] sm:$0xff] %v1542_v39  ;;  %v1544_v42 = vmax.f32 %v1466_v50, %v1512_v54 }
 0x311   : > { %1575 = vst [vmem:[%s2700_s16 + $0xa8] sm:$0xff] %v1543_v41  ;;  %v1545_v48 = vmax.f32 %v1468_v53, %v1513_v47  ;;  %v1471_v27 = vpop.f32.mrb[40].mxu1 }
 0x312   : > { %1576 = vst [vmem:[%s2700_s16 + $0xb0] sm:$0xff] %v1544_v42  ;;  %v1472_v55 = vadd.f32 %v1471_v27, %v2688_v7  ;;  %v1473_v16 = vpop.f32.mrb[41].mxu1 }
 0x313   : > { %1577 = vst [vmem:[%s2700_s16 + $0xb8] sm:$0xff] %v1545_v48  ;;  %v1474_v28 = vadd.f32 %v1473_v16, %v2692_v18  ;;  %v1475_v57 = vpop.f32.mrb[42].mxu1 }
 0x314   : > { %v1514_v58 = vmul.f32 0.01, %v1472_v55  ;;  %v1476_v59 = vadd.f32 %v1475_v57, %v2688_v7  ;;  %v1477_v60 = vpop.f32.mrb[43].mxu1 }
 0x315   : > { %v1515_v29 = vmul.f32 0.01, %v1474_v28  ;;  %v1478_v61 = vadd.f32 %v1477_v60, %v2692_v18 }
 0x316   : > { %v1546_v30 = vmax.f32 %v1472_v55, %v1514_v58  ;;  %v1516_v19 = vmul.f32 0.01, %v1476_v59 }
 0x317   : > { %v1547_v62 = vmax.f32 %v1474_v28, %v1515_v29  ;;  %v1517_v63 = vmul.f32 0.01, %v1478_v61 }
 0x318   : > { %1578 = vst [vmem:[%s2700_s16 + $0xc0] sm:$0xff] %v1546_v30  ;;  %v1548_v0 = vmax.f32 %v1476_v59, %v1516_v19 }
 0x319   : > { %1579 = vst [vmem:[%s2700_s16 + $0xc8] sm:$0xff] %v1547_v62  ;;  %v1549_v1 = vmax.f32 %v1478_v61, %v1517_v63  ;;  %v1481_v31 = vpop.f32.mrb[44].mxu1 }
 0x31a   : > { %1580 = vst [vmem:[%s2700_s16 + $0xd0] sm:$0xff] %v1548_v0  ;;  %v1482_v20 = vadd.f32 %v1481_v31, %v2688_v7  ;;  %v1483_v2 = vpop.f32.mrb[45].mxu1 }
 0x31b   : > { %1581 = vst [vmem:[%s2700_s16 + $0xd8] sm:$0xff] %v1549_v1  ;;  %v1484_v3 = vadd.f32 %v1483_v2, %v2692_v18  ;;  %v1485_v4 = vpop.f32.mrb[46].mxu1 }
 0x31c   : > { %v1518_v32 = vmul.f32 0.01, %v1482_v20  ;;  %v1486_v5 = vadd.f32 %v1485_v4, %v2688_v7  ;;  %v1487_v21 = vpop.f32.mrb[47].mxu1 }
 0x31d   : > { %v1519_v6 = vmul.f32 0.01, %v1484_v3  ;;  %v1488_v22 = vadd.f32 %v1487_v21, %v2692_v18 }
 0x31e   : > { %v1550_v33 = vmax.f32 %v1482_v20, %v1518_v32  ;;  %v1520_v56 = vmul.f32 0.01, %v1486_v5 }
 0x31f   : > { %v1551_v34 = vmax.f32 %v1484_v3, %v1519_v6  ;;  %v1521_v8 = vmul.f32 0.01, %v1488_v22 }
 0x320   : > { %1582 = vst [vmem:[%s2700_s16 + $0xe0] sm:$0xff] %v1550_v33  ;;  %v1552_v9 = vmax.f32 %v1486_v5, %v1520_v56 }
 0x321   : > { %1583 = vst [vmem:[%s2700_s16 + $0xe8] sm:$0xff] %v1551_v34  ;;  %v1553_v7 = vmax.f32 %v1488_v22, %v1521_v8 }
 0x322   : > { %1584 = vst [vmem:[%s2700_s16 + $0xf0] sm:$0xff] %v1552_v9 }
 0x323   : > { %1585 = vst [vmem:[%s2700_s16 + $0xf8] sm:$0xff] %v1553_v7 }
 0x324   : > { %2046 = shalt.err (!%p2043_p3)
}
 0x325   : > { %s2047_s8 = scalar_lea.hbm %s2764_s20, 4096  ;;  %s2051_s15 = scalar_lea.hbm %s2821_s7, 8192 }
 0x326   : > { %p2048_p4 = scmp.ne.s32.totalorder %s2764_s20, %s2047_s8  ;;  %p2052_p9 = scmp.lt.u32.totalorder %s2764_s20, %s2821_s7 }
 0x327   : > { %p2053_p10 = scmp.lt.u32.totalorder %s2051_s15, %s2047_s8  ;;  %p2055_p12 = scmp.lt.u32.totalorder %s2047_s8, %s2764_s20 }
 0x328   : > { %p2049_p7 = pnand %p2048_p4, %p2178_p5 }
 0x329   : > { %p2054_p11 = por %p2053_p10, %p2052_p9 }
 0x32a   : > { %p2050_p8 = pneg %p2049_p7 }
 0x32b   : > { %p2056_p13 = por %p2055_p12, %p2054_p11 }
 0x32d   : > { %p2057_p0 = pnand %p2056_p13, %p2050_p8 }
 0x32f   : > { %2060 = shalt.err (!%p2057_p0)
}
 0x330   : > { %s2098_s18 = smov 256   ;;  %s2099_s19 = smov 16  }
 0x331   : > { %1824 = dma.vmem_to_hbm [thread:$0]  (%p2178_p5), %s2766_s23, 4096, %s2764_s20, %s2773_s28, %s2098_s18, %s2098_s18, %s2099_s19  }
 0x332 PF: > { %p1830_p1 = scmp.ge.s32.totalorder %s2095_s27, 2  ;;  %s1616_s21 = sand.u32 1, %s2083_s24  }
 0x333   : > { %s1617_s22 = scalar_lea.sflag [#allocation3], %s1616_s21 }
 0x334   : > { %p1827_p2 = pnand %p1830_p1, %p2182_p6 }
 0x336   : > { %2078 = dma.done.wait (!%p1827_p2), %s1617_s22, 4096  }
 0x337   : > { %2080 = vsyncadd (!%p1827_p2), %s1617_s22, 4294963200  ;;  %p17_p3 = scmp.ge.s32.totalorder %s2165_s30, 4   ;;  %s2824_s24 = smov %s2087_s25 }
 0x338   : > { %s2825_s25 = smov %s2091_s26  ;;  %s2826_s26 = smov %s2176_s10 }
 0x339   : > { %s2827_s27 = smov %s2165_s30  ;;  %19 = sbr.rel (!%p17_p3) target bundleno = 3 (0x3), region = 83 }
 0x340   :  { %1622 = vsyncpa [#allocation3], 1 }
 0x341   :  { %1624 = vsyncpa [#allocation3 + $0x1], 1 }

</bundles_post_ra>
